<compile_context>
chip_gen: v5e
topology: v5e:2x2
jax: 0.10.0
libtpu: 0.0.40
codegen_flags: <defaults>
</compile_context>

<pallas_src>
import jax
import jax.numpy as jnp
from jax.experimental import pallas as pl
from jax.experimental.pallas import tpu as pltpu

IN_CHANNELS = 1489
MID_CHANNELS = 512
OUT_CHANNELS = 96
BATCH_TILE = 512       # large-B tile; ~11 MiB VMEM budget (x f32 dominates)


def _fingerprint_mlp_kernel(x_ref, w1_ref, b1_ref, w2_ref, b2_ref, o_ref):
    # fc1 on the MXU: bf16 x bf16 -> f32 accumulation. Cast is a no-op if the
    # caller already feeds bf16 activations.
    x_bf = x_ref[...].astype(jnp.bfloat16)
    h = jnp.dot(x_bf, w1_ref[...], preferred_element_type=jnp.float32)
    # dropout(p=0.2) is identity in eval mode; bias + ReLU in f32 on the VPU.
    h = jnp.maximum(h + b1_ref[...], 0.0)
    # fc2 on the MXU; h recast to bf16 only for the dot. N=96 store is a
    # masked vst — the vst slot is not the binding resource here.
    y = jnp.dot(h.astype(jnp.bfloat16), w2_ref[...],
                preferred_element_type=jnp.float32)
    o_ref[...] = (y + b2_ref[...]).astype(o_ref.dtype)


def _batch_tile(batch: int) -> int:
    """Pick the batch tile (static, from x.shape).

    * batch > 2*BATCH_TILE : fixed BATCH_TILE (multiple of 8).
    * otherwise            : round_up(cdiv(batch, 2), 8) so the grid has at
                             least two steps and both v7x TensorCores get
                             work; if that tile would cover the whole batch
                             (tiny batches), fall back to a single full block
                             (block dim == full array dim, so (8,128)-legal).
    """
    if batch > 2 * BATCH_TILE:
        return BATCH_TILE
    half = -(-batch // 2)            # cdiv(batch, 2)
    tb = -(-half // 8) * 8           # round up to the 8-row sublane granule
    return batch if tb >= batch else tb


@jax.jit
def fingerprint_component(x, w1, b1, w2, b2):
    """x: (B, IN_CHANNELS) f32 or bf16.
    w1: (IN_CHANNELS, MID) bf16, b1: (1, MID) f32,
    w2: (MID, OUT) bf16,        b2: (1, OUT) f32   (from pack_params).
    Returns (B, OUT_CHANNELS) f32 — no post-kernel slice/copy."""
    B, K = x.shape
    MID = w1.shape[1]
    OUT = w2.shape[1]
    tb = _batch_tile(B)
    grid = (pl.cdiv(B, tb),)

    return pl.pallas_call(
        _fingerprint_mlp_kernel,
        out_shape=jax.ShapeDtypeStruct((B, OUT), jnp.float32),
        grid=grid,
        in_specs=[
            pl.BlockSpec((tb, K), lambda i: (i, 0)),     # x tile (pipelined)
            pl.BlockSpec((K, MID), lambda i: (0, 0)),    # w1 (resident)
            pl.BlockSpec((1, MID), lambda i: (0, 0)),    # b1 (resident)
            pl.BlockSpec((MID, OUT), lambda i: (0, 0)),  # w2 (resident)
            pl.BlockSpec((1, OUT), lambda i: (0, 0)),    # b2 (resident)
        ],
        out_specs=pl.BlockSpec((tb, OUT), lambda i: (i, 0)),
        compiler_params=pltpu.CompilerParams(
            dimension_semantics=("parallel",),           # megacore sharding on v7x
            # Explicit budget: tb=512 needs ~11 MiB incl. double-buffered
            # weights; 32 MiB is safe vs v5e/v6e 128 MiB and v7x 64 MiB VMEM.
            vmem_limit_bytes=32 * 1024 * 1024,
        ),
    )(x, w1, b1, w2, b2)


def init_params(key, in_channels=IN_CHANNELS, mid_channels=MID_CHANNELS,
                out_channels=OUT_CHANNELS):
    """nn.Linear-style init (U[-1/sqrt(fan_in), 1/sqrt(fan_in)]).
    Weights returned transposed to (fan_in, fan_out), f32."""
    k1, k2, k3, k4 = jax.random.split(key, 4)
    lim1 = 1.0 / jnp.sqrt(in_channels)
    lim2 = 1.0 / jnp.sqrt(mid_channels)
    w1 = jax.random.uniform(k1, (in_channels, mid_channels), jnp.float32, -lim1, lim1)
    b1 = jax.random.uniform(k2, (mid_channels,), jnp.float32, -lim1, lim1)
    w2 = jax.random.uniform(k3, (mid_channels, out_channels), jnp.float32, -lim2, lim2)
    b2 = jax.random.uniform(k4, (out_channels,), jnp.float32, -lim2, lim2)
    return w1, b1, w2, b2


def pack_params(w1, b1, w2, b2):
    """One-time packing (outside the per-call path): bf16 weights, f32 biases
    as (1, N) rows. No output padding — the kernel writes (B, 96) directly."""
    w1_p = w1.astype(jnp.bfloat16)
    b1_p = b1.reshape(1, -1).astype(jnp.float32)
    w2_p = w2.astype(jnp.bfloat16)
    b2_p = b2.reshape(1, -1).astype(jnp.float32)
    return w1_p, b1_p, w2_p, b2_p


def _reference(x, w1_bf, b1, w2_bf, b2):
    """Same bf16-weight / f32-accumulate math as the kernel (dropout=identity)."""
    h = jnp.dot(x.astype(jnp.bfloat16), w1_bf,
                preferred_element_type=jnp.float32) + b1
    h = jnp.maximum(h, 0.0)
    y = jnp.dot(h.astype(jnp.bfloat16), w2_bf,
                preferred_element_type=jnp.float32) + b2
    return y


if __name__ == "__main__":
    key = jax.random.PRNGKey(0)
    kx, kx2, kp = jax.random.split(key, 3)

    w1, b1, w2, b2 = init_params(kp)
    w1_p, b1_p, w2_p, b2_p = pack_params(w1, b1, w2, b2)
    w1_ref, w2_ref = w1.astype(jnp.bfloat16), w2.astype(jnp.bfloat16)

    # Case 1: tiny batch -> single full block (block dim == array dim).
    B1 = 4
    x1 = jax.random.normal(kx, (B1, IN_CHANNELS), jnp.float32)
    y1 = fingerprint_component(x1, w1_p, b1_p, w2_p, b2_p)
    jax.block_until_ready(y1)
    assert y1.shape == (B1, OUT_CHANNELS), y1.shape
    r1 = _reference(x1, w1_ref, b1, w2_ref, b2)
    err1 = float(jnp.max(jnp.abs(y1 - r1)))
    assert jnp.allclose(y1, r1, atol=1e-2, rtol=1e-2), err1

    # Case 2: batch split into 2 grid steps (partial last block is masked).
    B2 = 20  # tb = round_up(cdiv(20, 2), 8) = 16 -> grid = (2,)
    x2 = jax.random.normal(kx2, (B2, IN_CHANNELS), jnp.float32)
    y2 = fingerprint_component(x2, w1_p, b1_p, w2_p, b2_p)
    jax.block_until_ready(y2)
    assert y2.shape == (B2, OUT_CHANNELS), y2.shape
    r2 = _reference(x2, w1_ref, b1, w2_ref, b2)
    err2 = float(jnp.max(jnp.abs(y2 - r2)))
    assert jnp.allclose(y2, r2, atol=1e-2, rtol=1e-2), err2

    print("KERNEL_OK")
</pallas_src>

<mosaic_0001>
module attributes {stable_mosaic.version = 11 : i64} {
  func.func @_fingerprint_mlp_kernel(%arg0: i32, %arg1: memref<4x1489xf32, #tpu.memory_space<vmem>>, %arg2: memref<1489x512xbf16, #tpu.memory_space<vmem>>, %arg3: memref<1x512xf32, #tpu.memory_space<vmem>>, %arg4: memref<512x96xbf16, #tpu.memory_space<vmem>>, %arg5: memref<1x96xf32, #tpu.memory_space<vmem>>, %arg6: memref<4x96xf32, #tpu.memory_space<vmem>>) attributes {dimension_semantics = [#tpu.dimension_semantics<parallel>], iteration_bounds = array<i64: 1>, scalar_prefetch = 0 : i64, scratch_operands = 0 : i64, tpu.core_type = #tpu.core_type<tc>, window_params = [{transform_indices = @transform_0, window_bounds = array<i64: 4, 1489>}, {pipeline_mode = #tpu.pipeline_mode<synchronous>, transform_indices = @transform_1, window_bounds = array<i64: 1489, 512>}, {pipeline_mode = #tpu.pipeline_mode<synchronous>, transform_indices = @transform_2, window_bounds = array<i64: 1, 512>}, {pipeline_mode = #tpu.pipeline_mode<synchronous>, transform_indices = @transform_3, window_bounds = array<i64: 512, 96>}, {pipeline_mode = #tpu.pipeline_mode<synchronous>, transform_indices = @transform_4, window_bounds = array<i64: 1, 96>}, {transform_indices = @transform_5, window_bounds = array<i64: 4, 96>}]} {
    %c0 = arith.constant 0 : index
    %c0_0 = arith.constant 0 : index
    %0 = vector.load %arg1[%c0, %c0_0] : memref<4x1489xf32, #tpu.memory_space<vmem>>, vector<4x1489xf32>
    %1 = arith.truncf %0 : vector<4x1489xf32> to vector<4x1489xbf16>
    %c0_1 = arith.constant 0 : index
    %c0_2 = arith.constant 0 : index
    %2 = vector.load %arg2[%c0_1, %c0_2] : memref<1489x512xbf16, #tpu.memory_space<vmem>>, vector<1489x512xbf16>
    %cst = arith.constant dense<0.000000e+00> : vector<4x512xf32>
    %3 = tpu.matmul %1, %2, %cst {dimension_numbers = #tpu.dot_dimension_numbers<[1], [0], [0], [1], [0, 0, 1, 1], [], []>} : vector<4x1489xbf16>, vector<1489x512xbf16>, vector<4x512xf32> -> vector<4x512xf32>
    %c0_3 = arith.constant 0 : index
    %c0_4 = arith.constant 0 : index
    %4 = vector.load %arg3[%c0_3, %c0_4] : memref<1x512xf32, #tpu.memory_space<vmem>>, vector<1x512xf32>
    %5 = vector.broadcast %4 : vector<1x512xf32> to vector<4x512xf32>
    %6 = arith.addf %3, %5 : vector<4x512xf32>
    %cst_5 = arith.constant 0.000000e+00 : f32
    %7 = vector.broadcast %cst_5 : f32 to vector<4x512xf32>
    %8 = arith.maximumf %6, %7 : vector<4x512xf32>
    %9 = arith.truncf %8 : vector<4x512xf32> to vector<4x512xbf16>
    %c0_6 = arith.constant 0 : index
    %c0_7 = arith.constant 0 : index
    %10 = vector.load %arg4[%c0_6, %c0_7] : memref<512x96xbf16, #tpu.memory_space<vmem>>, vector<512x96xbf16>
    %cst_8 = arith.constant dense<0.000000e+00> : vector<4x96xf32>
    %11 = tpu.matmul %9, %10, %cst_8 {dimension_numbers = #tpu.dot_dimension_numbers<[1], [0], [0], [1], [0, 0, 1, 1], [], []>} : vector<4x512xbf16>, vector<512x96xbf16>, vector<4x96xf32> -> vector<4x96xf32>
    %c0_9 = arith.constant 0 : index
    %c0_10 = arith.constant 0 : index
    %12 = vector.load %arg5[%c0_9, %c0_10] : memref<1x96xf32, #tpu.memory_space<vmem>>, vector<1x96xf32>
    %13 = vector.broadcast %12 : vector<1x96xf32> to vector<4x96xf32>
    %14 = arith.addf %11, %13 : vector<4x96xf32>
    %c0_11 = arith.constant 0 : index
    %c0_12 = arith.constant 0 : index
    %15 = vector.load %arg6[%c0_11, %c0_12] : memref<4x96xf32, #tpu.memory_space<vmem>>, vector<4x96xf32>
    tpu.vector_store %arg6[%c0_11, %c0_12], %14 {strides = array<i32>} : memref<4x96xf32, #tpu.memory_space<vmem>>, vector<4x96xf32>,
    return
  }
  func.func @transform_0(%arg0: i32) -> (i32, i32) {
    %c0_i32 = arith.constant 0 : i32
    %c0_i32_0 = arith.constant 0 : i32
    return %arg0, %c0_i32 : i32, i32
  }
  func.func @transform_1(%arg0: i32) -> (i32, i32) {
    %c0_i32 = arith.constant 0 : i32
    %c0_i32_0 = arith.constant 0 : i32
    %c0_i32_1 = arith.constant 0 : i32
    return %c0_i32, %c0_i32_0 : i32, i32
  }
  func.func @transform_2(%arg0: i32) -> (i32, i32) {
    %c0_i32 = arith.constant 0 : i32
    %c0_i32_0 = arith.constant 0 : i32
    %c0_i32_1 = arith.constant 0 : i32
    return %c0_i32, %c0_i32_0 : i32, i32
  }
  func.func @transform_3(%arg0: i32) -> (i32, i32) {
    %c0_i32 = arith.constant 0 : i32
    %c0_i32_0 = arith.constant 0 : i32
    %c0_i32_1 = arith.constant 0 : i32
    return %c0_i32, %c0_i32_0 : i32, i32
  }
  func.func @transform_4(%arg0: i32) -> (i32, i32) {
    %c0_i32 = arith.constant 0 : i32
    %c0_i32_0 = arith.constant 0 : i32
    %c0_i32_1 = arith.constant 0 : i32
    return %c0_i32, %c0_i32_0 : i32, i32
  }
  func.func @transform_5(%arg0: i32) -> (i32, i32) {
    %c0_i32 = arith.constant 0 : i32
    %c0_i32_0 = arith.constant 0 : i32
    return %arg0, %c0_i32 : i32, i32
  }
}

</mosaic_0001>

<bundles_post_ra>
// kernel: fingerprint_component.1
= control target key start
LH: loop header
LB: loop body
LE: loop exit
PB: predicated region body
PF: predicated region fallthrough
CT: control target
= control target key end

     0   :  { %10 = vsyncpa [#allocation3], 0  ;;  %s5811_s0 = inlined_call_operand.hbm [shape: f32[4,1489], index: 0, kind: input, shape index: {}]   ;;  %s5812_s1 = inlined_call_operand.hbm [shape: bf16[1489,512], index: 1, kind: input, shape index: {}]   ;;  %s5813_s2 = inlined_call_operand.hbm [shape: f32[1,512], index: 2, kind: input, shape index: {}]   ;;  %s5814_s3 = inlined_call_operand.vmem [shape: bf16[512,96], index: 3, kind: input, shape index: {}]   ;;  %s5815_s4 = inlined_call_operand.hbm [shape: f32[1,96], index: 4, kind: input, shape index: {}]   ;;  %s5816_s5 = inlined_call_operand.hbm [shape: f32[4,96], index: 5, kind: output, shape index: {}]  }
   0x1   :  { %11 = vsyncpa [#allocation6], 0 }
   0x2   :  { %12 = vsyncpa [#allocation9], 0  ;;  %s29_s20 = sshll.u32 %s5812_s1, 4  ;;  %s30_s20 = int_to_ptr.hbm [resolvable:$true] %s29_s20 }
   0x3   :  { %13 = vsyncpa [#allocation4], 0  ;;  %s5536_s21 = smov [#allocation5]   ;;  %s19_s25 = sshll.u32 %s5811_s0, 4  ;;  %s20_s25 = int_to_ptr.hbm [resolvable:$true] %s19_s25 }
   0x4   :  { %s31_s22 = sshll.u32 %s5536_s21, 4  ;;  %s5537_s26 = smov 256   ;;  %s32_s22 = int_to_ptr.vmem [resolvable:$true] %s31_s22 }
   0x5   :  { %s5538_s27 = smov 16   ;;  %s5539_s28 = smov [#allocation2]  }
   0x6   :  { %37 = dma.hbm_to_vmem [thread:$0]  %s30_s20, 47872, %s32_s22, [#allocation6], %s5537_s26, %s5537_s26, %s5538_s27  }
   0x7   :  { %s21_s29 = sshll.u32 %s5539_s28, 4  ;;  %s43_s7 = sshll.u32 %s5813_s2, 4  ;;  %s22_s29 = int_to_ptr.vmem [resolvable:$true] %s21_s29  ;;  %s44_s7 = int_to_ptr.hbm [resolvable:$true] %s43_s7 }
   0x8   :  { %24 = dma.hbm_to_vmem [thread:$0]  %s20_s25, 768, %s22_s29, [#allocation3]  }
   0x9   :  { %s56_s9 = sshll.u32 %s5815_s4, 4  ;;  %s5540_s10 = smov [#allocation7]   ;;  %s57_s9 = int_to_ptr.hbm [resolvable:$true] %s56_s9 }
   0xa   :  { %s45_s11 = sshll.u32 %s5540_s10, 4  ;;  %s5541_s0 = smov [#allocation8]   ;;  %s46_s11 = int_to_ptr.vmem [resolvable:$true] %s45_s11 }
   0xb   :  { %48 = dma.hbm_to_vmem [thread:$0]  %s44_s7, 64, %s46_s11, [#allocation6]  }
   0xc   :  { %s58_s12 = sshll.u32 %s5541_s0, 4  ;;  %s59_s12 = int_to_ptr.vmem [resolvable:$true] %s58_s12 }
   0xd   :  { %61 = dma.hbm_to_vmem [thread:$0]  %s57_s9, 16, %s59_s12, [#allocation9]  }
   0xe   :  { %5528 = dma.done.wait [#allocation3], 768  }
   0xf   :  { %5529 = vsyncadd [#allocation3], 4294966528 }
  0x10   :  { %5530 = dma.done.wait [#allocation6], 47936  }
  0x11   :  { %5531 = vsyncadd [#allocation6], 4294919360 }
  0x12   :  { %5532 = dma.done.wait [#allocation9], 16  }
  0x13   :  { %5533 = vsyncadd [#allocation9], 4294967280  ;;  %v3488_v0 = vld [vmem:[#allocation5 + $0xe0] sm:$0xf]  ;;  %v5024_v1 = vld [vmem:[#allocation5 + $0xec] sm:$0xf0] }
  0x14   :  { %v3616_v2 = vld [vmem:[#allocation5 + $0x1e0] sm:$0xf]  ;;  %v3489_v3 = vor.u32 %v5024_v1, %v3488_v0  ;;  %v5056_v4 = vld [vmem:[#allocation5 + $0x1ec] sm:$0xf0]  ;;  %vm2394_vm0 = vcmask 1040384   ;;  %vm2390_vm1 = vcmask 662528  }
  0x15   :  { %v3744_v5 = vld [vmem:[#allocation5 + $0x2e0] sm:$0xf]  ;;  %v5088_v6 = vld [vmem:[#allocation5 + $0x2ec] sm:$0xf0]  ;;  %v3617_v7 = vor.u32 %v5056_v4, %v3616_v2  ;;  %s3362_s20 = sshll.u32 %s5816_s5, 4  ;;  %vm3353_vm2 = vcmask 781312   ;;  %s3363_s20 = int_to_ptr.hbm [resolvable:$true] %s3362_s20 }
  0x16   :  { %v3745_v8 = vor.u32 %v5088_v6, %v3744_v5  ;;  %v3872_v9 = vld [vmem:[#allocation5 + $0x3e0] sm:$0xf]  ;;  %v5120_v10 = vld [vmem:[#allocation5 + $0x3ec] sm:$0xf0]  ;;  %2409 = vmatpush.bf16.msra.mxu0 %v3489_v3 }
  0x17   :  { %v3472_v11 = vld [vmem:[#allocation5 + $0xc0] sm:$0xf]  ;;  %v3873_v12 = vor.u32 %v5120_v10, %v3872_v9  ;;  %v5020_v13 = vld [vmem:[#allocation5 + $0xcc] sm:$0xf0]  ;;  %2422 = vmatpush.bf16.msra.mxu1 %v3617_v7 }
  0x18   :  { %v3600_v14 = vld [vmem:[#allocation5 + $0x1c0] sm:$0xf]  ;;  %v5052_v15 = vld [vmem:[#allocation5 + $0x1cc] sm:$0xf0]  ;;  %2435 = vmatpush.bf16.msra.mxu2 %v3745_v8  ;;  %v3473_v16 = vor.u32 %v5020_v13, %v3472_v11 }
  0x19   :  { %v3601_v17 = vor.u32 %v5052_v15, %v3600_v14  ;;  %v3728_v18 = vld [vmem:[#allocation5 + $0x2c0] sm:$0xf]  ;;  %v5084_v19 = vld [vmem:[#allocation5 + $0x2cc] sm:$0xf0]  ;;  %2448 = vmatpush.bf16.msra.mxu3 %v3873_v12 }
  0x1a   :  { %v3856_v20 = vld [vmem:[#allocation5 + $0x3c0] sm:$0xf]  ;;  %v3729_v21 = vor.u32 %v5084_v19, %v3728_v18  ;;  %v5116_v22 = vld [vmem:[#allocation5 + $0x3cc] sm:$0xf0]  ;;  %2410 = vmatpush.bf16.msra.mxu0 %v3473_v16 }
  0x1b   :  { %v3456_v23 = vld [vmem:[#allocation5 + $0xa0] sm:$0xf]  ;;  %v5016_v24 = vld [vmem:[#allocation5 + $0xac] sm:$0xf0]  ;;  %v3857_v25 = vor.u32 %v5116_v22, %v3856_v20  ;;  %2423 = vmatpush.bf16.msra.mxu1 %v3601_v17 }
  0x1c   :  { %v3584_v26 = vld [vmem:[#allocation5 + $0x1a0] sm:$0xf]  ;;  %v5048_v27 = vld [vmem:[#allocation5 + $0x1ac] sm:$0xf0]  ;;  %v3457_v29 = vor.u32 %v5016_v24, %v3456_v23  ;;  %2436 = vmatpush.bf16.msra.mxu2 %v3729_v21 }
  0x1d   :  { %v3712_v28 = vld [vmem:[#allocation5 + $0x2a0] sm:$0xf]  ;;  %v5080_v30 = vld [vmem:[#allocation5 + $0x2ac] sm:$0xf0]  ;;  %v3585_v33 = vor.u32 %v5048_v27, %v3584_v26  ;;  %2449 = vmatpush.bf16.msra.mxu3 %v3857_v25 }
  0x1e   :  { %v3840_v31 = vld [vmem:[#allocation5 + $0x3a0] sm:$0xf]  ;;  %v5112_v32 = vld [vmem:[#allocation5 + $0x3ac] sm:$0xf0]  ;;  %v3713_v34 = vor.u32 %v5080_v30, %v3712_v28  ;;  %2411 = vmatpush.bf16.msra.mxu0 %v3457_v29 }
  0x1f   :  { %v3440_v35 = vld [vmem:[#allocation5 + $0x80] sm:$0xf]  ;;  %v5012_v36 = vld [vmem:[#allocation5 + $0x8c] sm:$0xf0]  ;;  %v3841_v38 = vor.u32 %v5112_v32, %v3840_v31  ;;  %2424 = vmatpush.bf16.msra.mxu1 %v3585_v33 }
  0x20   :  { %v3568_v37 = vld [vmem:[#allocation5 + $0x180] sm:$0xf]  ;;  %v5044_v39 = vld [vmem:[#allocation5 + $0x18c] sm:$0xf0]  ;;  %v3441_v44 = vor.u32 %v5012_v36, %v3440_v35  ;;  %2437 = vmatpush.bf16.msra.mxu2 %v3713_v34 }
  0x21   :  { %v3696_v40 = vld [vmem:[#allocation5 + $0x280] sm:$0xf]  ;;  %v5076_v41 = vld [vmem:[#allocation5 + $0x28c] sm:$0xf0]  ;;  %v3569_v45 = vor.u32 %v5044_v39, %v3568_v37  ;;  %2450 = vmatpush.bf16.msra.mxu3 %v3841_v38 }
  0x22   :  { %v3824_v42 = vld [vmem:[#allocation5 + $0x380] sm:$0xf]  ;;  %v5108_v43 = vld [vmem:[#allocation5 + $0x38c] sm:$0xf0]  ;;  %v3697_v46 = vor.u32 %v5076_v41, %v3696_v40  ;;  %2412 = vmatpush.bf16.msra.mxu0 %v3441_v44 }
  0x23   :  { %v3424_v47 = vld [vmem:[#allocation5 + $0x60] sm:$0xf]  ;;  %v5008_v48 = vld [vmem:[#allocation5 + $0x6c] sm:$0xf0]  ;;  %v3825_v50 = vor.u32 %v5108_v43, %v3824_v42  ;;  %2425 = vmatpush.bf16.msra.mxu1 %v3569_v45 }
  0x24   :  { %v3552_v49 = vld [vmem:[#allocation5 + $0x160] sm:$0xf]  ;;  %v5040_v51 = vld [vmem:[#allocation5 + $0x16c] sm:$0xf0]  ;;  %v3425_v56 = vor.u32 %v5008_v48, %v3424_v47  ;;  %2438 = vmatpush.bf16.msra.mxu2 %v3697_v46 }
  0x25   :  { %v3680_v52 = vld [vmem:[#allocation5 + $0x260] sm:$0xf]  ;;  %v5072_v53 = vld [vmem:[#allocation5 + $0x26c] sm:$0xf0]  ;;  %v3553_v57 = vor.u32 %v5040_v51, %v3552_v49  ;;  %2451 = vmatpush.bf16.msra.mxu3 %v3825_v50 }
  0x26   :  { %v3808_v54 = vld [vmem:[#allocation5 + $0x360] sm:$0xf]  ;;  %v5104_v55 = vld [vmem:[#allocation5 + $0x36c] sm:$0xf0]  ;;  %v3681_v58 = vor.u32 %v5072_v53, %v3680_v52  ;;  %2413 = vmatpush.bf16.msra.mxu0 %v3425_v56 }
  0x27   :  { %v3408_v59 = vld [vmem:[#allocation5 + $0x40] sm:$0xf]  ;;  %v5004_v60 = vld [vmem:[#allocation5 + $0x4c] sm:$0xf0]  ;;  %v3809_v62 = vor.u32 %v5104_v55, %v3808_v54  ;;  %2426 = vmatpush.bf16.msra.mxu1 %v3553_v57 }
  0x28   :  { %v3536_v61 = vld [vmem:[#allocation5 + $0x140] sm:$0xf]  ;;  %v5036_v63 = vld [vmem:[#allocation5 + $0x14c] sm:$0xf0]  ;;  %v3409_v4 = vor.u32 %v5004_v60, %v3408_v59  ;;  %2439 = vmatpush.bf16.msra.mxu2 %v3681_v58 }
  0x29   :  { %v3664_v0 = vld [vmem:[#allocation5 + $0x240] sm:$0xf]  ;;  %v5068_v1 = vld [vmem:[#allocation5 + $0x24c] sm:$0xf0]  ;;  %v3537_v5 = vor.u32 %v5036_v63, %v3536_v61  ;;  %2452 = vmatpush.bf16.msra.mxu3 %v3809_v62 }
  0x2a   :  { %v3792_v2 = vld [vmem:[#allocation5 + $0x340] sm:$0xf]  ;;  %v5100_v3 = vld [vmem:[#allocation5 + $0x34c] sm:$0xf0]  ;;  %v3665_v6 = vor.u32 %v5068_v1, %v3664_v0  ;;  %2414 = vmatpush.bf16.msra.mxu0 %v3409_v4 }
  0x2b   :  { %v3392_v7 = vld [vmem:[#allocation5 + $0x20] sm:$0xf]  ;;  %v5000_v8 = vld [vmem:[#allocation5 + $0x2c] sm:$0xf0]  ;;  %v3793_v10 = vor.u32 %v5100_v3, %v3792_v2  ;;  %2427 = vmatpush.bf16.msra.mxu1 %v3537_v5  ;;  %v80_v3 = vld [vmem:[#allocation2 + $0x8] sm:$0xff] }
  0x2c   :  { %v3520_v9 = vld [vmem:[#allocation5 + $0x120] sm:$0xf]  ;;  %v5032_v11 = vld [vmem:[#allocation5 + $0x12c] sm:$0xf0]  ;;  %v3393_v16 = vor.u32 %v5000_v8, %v3392_v7  ;;  %2440 = vmatpush.bf16.msra.mxu2 %v3665_v6  ;;  %93 = vst [vmem:[#allocation1 + $0x10] ss:$2 sm:$0xff] %v80_v3 }
  0x2d   :  { %v3648_v12 = vld [vmem:[#allocation5 + $0x220] sm:$0xf]  ;;  %v5064_v13 = vld [vmem:[#allocation5 + $0x22c] sm:$0xf0]  ;;  %v3521_v19 = vor.u32 %v5032_v11, %v3520_v9  ;;  %2453 = vmatpush.bf16.msra.mxu3 %v3793_v10 }
  0x2e   :  { %v3776_v14 = vld [vmem:[#allocation5 + $0x320] sm:$0xf]  ;;  %v5096_v15 = vld [vmem:[#allocation5 + $0x32c] sm:$0xf0]  ;;  %v3649_v20 = vor.u32 %v5064_v13, %v3648_v12  ;;  %2415 = vmatpush.bf16.msra.mxu0 %v3393_v16 }
  0x2f   :  { %v3376_v17 = vld [vmem:[#allocation5] sm:$0xf]  ;;  %v4996_v18 = vld [vmem:[#allocation5 + $0xc] sm:$0xf0]  ;;  %v3777_v24 = vor.u32 %v5096_v15, %v3776_v14  ;;  %2428 = vmatpush.bf16.msra.mxu1 %v3521_v19 }
  0x30   :  { %v3504_v21 = vld [vmem:[#allocation5 + $0x100] sm:$0xf]  ;;  %v5028_v22 = vld [vmem:[#allocation5 + $0x10c] sm:$0xf0]  ;;  %v3377_v31 = vor.u32 %v4996_v18, %v3376_v17  ;;  %2441 = vmatpush.bf16.msra.mxu2 %v3649_v20 }
  0x31   :  { %v3632_v23 = vld [vmem:[#allocation5 + $0x200] sm:$0xf]  ;;  %v5060_v25 = vld [vmem:[#allocation5 + $0x20c] sm:$0xf0]  ;;  %v3505_v35 = vor.u32 %v5028_v22, %v3504_v21  ;;  %2454 = vmatpush.bf16.msra.mxu3 %v3777_v24 }
  0x32   :  { %v3760_v26 = vld [vmem:[#allocation5 + $0x300] sm:$0xf]  ;;  %v5092_v27 = vld [vmem:[#allocation5 + $0x30c] sm:$0xf0]  ;;  %v3633_v36 = vor.u32 %v5060_v25, %v3632_v23  ;;  %2416 = vmatpush.bf16.msra.mxu0 %v3377_v31 }
  0x33   :  { %v4000_v28 = vld [vmem:[#allocation5 + $0x4e0] sm:$0xf]  ;;  %v5152_v29 = vld [vmem:[#allocation5 + $0x4ec] sm:$0xf0]  ;;  %v3761_v39 = vor.u32 %v5092_v27, %v3760_v26  ;;  %2429 = vmatpush.bf16.msra.mxu1 %v3505_v35  ;;  %v84_v26 = vld [vmem:[#allocation2 + $0x28] sm:$0xff] }
  0x34   :  { %v4128_v30 = vld [vmem:[#allocation5 + $0x5e0] sm:$0xf]  ;;  %v5184_v32 = vld [vmem:[#allocation5 + $0x5ec] sm:$0xf0]  ;;  %v4001_v40 = vor.u32 %v5152_v29, %v4000_v28  ;;  %2442 = vmatpush.bf16.msra.mxu2 %v3633_v36 }
  0x35   :  { %v4256_v33 = vld [vmem:[#allocation5 + $0x6e0] sm:$0xf]  ;;  %v5216_v34 = vld [vmem:[#allocation5 + $0x6ec] sm:$0xf0]  ;;  %v4129_v41 = vor.u32 %v5184_v32, %v4128_v30  ;;  %2455 = vmatpush.bf16.msra.mxu3 %v3761_v39 }
  0x36   :  { %v4384_v37 = vld [vmem:[#allocation5 + $0x7e0] sm:$0xf]  ;;  %v5248_v38 = vld [vmem:[#allocation5 + $0x7ec] sm:$0xf0]  ;;  %v4257_v42 = vor.u32 %v5216_v34, %v4256_v33  ;;  %2461 = vmatpush.bf16.msrb.mxu0 %v4001_v40 }
  0x37   :  { %v3984_v43 = vld [vmem:[#allocation5 + $0x4c0] sm:$0xf]  ;;  %v5148_v44 = vld [vmem:[#allocation5 + $0x4cc] sm:$0xf0]  ;;  %v4385_v46 = vor.u32 %v5248_v38, %v4384_v37  ;;  %2474 = vmatpush.bf16.msrb.mxu1 %v4129_v41 }
  0x38   :  { %v4112_v45 = vld [vmem:[#allocation5 + $0x5c0] sm:$0xf]  ;;  %v5180_v47 = vld [vmem:[#allocation5 + $0x5cc] sm:$0xf0]  ;;  %v3985_v52 = vor.u32 %v5148_v44, %v3984_v43  ;;  %2487 = vmatpush.bf16.msrb.mxu2 %v4257_v42 }
  0x39   :  { %v4240_v48 = vld [vmem:[#allocation5 + $0x6c0] sm:$0xf]  ;;  %v5212_v49 = vld [vmem:[#allocation5 + $0x6cc] sm:$0xf0]  ;;  %v4113_v53 = vor.u32 %v5180_v47, %v4112_v45  ;;  %2500 = vmatpush.bf16.msrb.mxu3 %v4385_v46 }
  0x3a   :  { %v4368_v50 = vld [vmem:[#allocation5 + $0x7c0] sm:$0xf]  ;;  %v5244_v51 = vld [vmem:[#allocation5 + $0x7cc] sm:$0xf0]  ;;  %v4241_v54 = vor.u32 %v5212_v49, %v4240_v48  ;;  %2462 = vmatpush.bf16.msrb.mxu0 %v3985_v52 }
  0x3b   :  { %v3968_v55 = vld [vmem:[#allocation5 + $0x4a0] sm:$0xf]  ;;  %v5144_v56 = vld [vmem:[#allocation5 + $0x4ac] sm:$0xf0]  ;;  %v4369_v58 = vor.u32 %v5244_v51, %v4368_v50  ;;  %2475 = vmatpush.bf16.msrb.mxu1 %v4113_v53  ;;  %v82_v51 = vld [vmem:[#allocation2 + $0x18] sm:$0xff] }
  0x3c   :  { %v4096_v57 = vld [vmem:[#allocation5 + $0x5a0] sm:$0xf]  ;;  %v5176_v59 = vld [vmem:[#allocation5 + $0x5ac] sm:$0xf0]  ;;  %v3969_v1 = vor.u32 %v5144_v56, %v3968_v55  ;;  %2488 = vmatpush.bf16.msrb.mxu2 %v4241_v54  ;;  %97 = vst [vmem:[#allocation1 + $0x30] ss:$2 sm:$0xff] %v82_v51 }
  0x3d   :  { %v4224_v60 = vld [vmem:[#allocation5 + $0x6a0] sm:$0xf]  ;;  %v5208_v61 = vld [vmem:[#allocation5 + $0x6ac] sm:$0xf0]  ;;  %v4097_v5 = vor.u32 %v5176_v59, %v4096_v57  ;;  %2501 = vmatpush.bf16.msrb.mxu3 %v4369_v58 }
  0x3e   :  { %v4352_v62 = vld [vmem:[#allocation5 + $0x7a0] sm:$0xf]  ;;  %v5240_v63 = vld [vmem:[#allocation5 + $0x7ac] sm:$0xf0]  ;;  %v4225_v6 = vor.u32 %v5208_v61, %v4224_v60  ;;  %2463 = vmatpush.bf16.msrb.mxu0 %v3969_v1 }
  0x3f   :  { %v3952_v0 = vld [vmem:[#allocation5 + $0x480] sm:$0xf]  ;;  %v5140_v2 = vld [vmem:[#allocation5 + $0x48c] sm:$0xf0]  ;;  %v4353_v9 = vor.u32 %v5240_v63, %v4352_v62  ;;  %2476 = vmatpush.bf16.msrb.mxu1 %v4097_v5 }
  0x40   :  { %v79_v4 = vld [vmem:[#allocation2] sm:$0xff]  ;;  %v4080_v7 = vld [vmem:[#allocation5 + $0x580] sm:$0xf]  ;;  %v3953_v14 = vor.u32 %v5140_v2, %v3952_v0  ;;  %2489 = vmatpush.bf16.msrb.mxu2 %v4225_v6  ;;  %v100_v35 = vld.sshfl [vmem:[#allocation1 + $0x10] sm:$0xff pattern:$0x75316420] }
  0x41   :  { %v5172_v8 = vld [vmem:[#allocation5 + $0x58c] sm:$0xf0]  ;;  %v4208_v10 = vld [vmem:[#allocation5 + $0x680] sm:$0xf]  ;;  %91 = vst [vmem:[#allocation1] ss:$2 sm:$0xff] %v79_v4  ;;  %2502 = vmatpush.bf16.msrb.mxu3 %v4353_v9  ;;  %v5586_v38 = vpack.c.bf16 %v100_v35, %v100_v35 }
  0x42   :  { %v5204_v11 = vld [vmem:[#allocation5 + $0x68c] sm:$0xf0]  ;;  %v4336_v12 = vld [vmem:[#allocation5 + $0x780] sm:$0xf]  ;;  %v4081_v18 = vor.u32 %v5172_v8, %v4080_v7  ;;  %2464 = vmatpush.bf16.msrb.mxu0 %v3953_v14 }
  0x43   :  { %v5236_v13 = vld [vmem:[#allocation5 + $0x78c] sm:$0xf0]  ;;  %v3936_v15 = vld [vmem:[#allocation5 + $0x460] sm:$0xf]  ;;  %v4209_v19 = vor.u32 %v5204_v11, %v4208_v10  ;;  %2443 = vmatmul.bf16.vlgmr.msra.gmra.mxu2 %v5586_v38 }
  0x44   :  { %v5136_v16 = vld [vmem:[#allocation5 + $0x46c] sm:$0xf0]  ;;  %v4064_v17 = vld [vmem:[#allocation5 + $0x560] sm:$0xf]  ;;  %v4337_v23 = vor.u32 %v5236_v13, %v4336_v12  ;;  %2477 = vmatpush.bf16.msrb.mxu1 %v4081_v18 }
  0x45   :  { %v5168_v20 = vld [vmem:[#allocation5 + $0x56c] sm:$0xf0]  ;;  %v4192_v21 = vld [vmem:[#allocation5 + $0x660] sm:$0xf]  ;;  %v3937_v30 = vor.u32 %v5136_v16, %v3936_v15  ;;  %2490 = vmatpush.bf16.msrb.mxu2 %v4209_v19 }
  0x46   :  { %v5200_v22 = vld [vmem:[#allocation5 + $0x66c] sm:$0xf0]  ;;  %v4320_v24 = vld [vmem:[#allocation5 + $0x760] sm:$0xf]  ;;  %v4065_v31 = vor.u32 %v5168_v20, %v4064_v17  ;;  %2503 = vmatpush.bf16.msrb.mxu3 %v4337_v23 }
  0x47   :  { %v5232_v25 = vld [vmem:[#allocation5 + $0x76c] sm:$0xf0]  ;;  %v3920_v27 = vld [vmem:[#allocation5 + $0x440] sm:$0xf]  ;;  %v4193_v37 = vor.u32 %v5200_v22, %v4192_v21  ;;  %2465 = vmatpush.bf16.msrb.mxu0 %v3937_v30  ;;  %v5542_v22 = vmov 0  }
  0x48   :  { %v5132_v28 = vld [vmem:[#allocation5 + $0x44c] sm:$0xf0]  ;;  %v4048_v32 = vld [vmem:[#allocation5 + $0x540] sm:$0xf]  ;;  %v4321_v41 = vor.u32 %v5232_v25, %v4320_v24  ;;  %2478 = vmatpush.bf16.msrb.mxu1 %v4065_v31  ;;  %v5602_v23 = vsel %vm2394_vm0, 65535, %v5542_v22 }
  0x49   :  { %v83_v29 = vld [vmem:[#allocation2 + $0x20] sm:$0xff]  ;;  %v4176_v34 = vld [vmem:[#allocation5 + $0x640] sm:$0xf]  ;;  %v98_v39 = vld.sshfl [vmem:[#allocation1] sm:$0xff pattern:$0x75316420]  ;;  %v3921_v48 = vor.u32 %v5132_v28, %v3920_v27  ;;  %2491 = vmatpush.bf16.msrb.mxu2 %v4193_v37 }
  0x4a   :  { %v5164_v33 = vld [vmem:[#allocation5 + $0x54c] sm:$0xf0]  ;;  %v101_v36 = vld.sshfl [vmem:[#allocation1 + $0x18] sm:$0xff pattern:$0x75316420]  ;;  %v5590_v43 = vpack.c.bf16 %v98_v39, %v98_v39  ;;  %2504 = vmatpush.bf16.msrb.mxu3 %v4321_v41 }
  0x4b   :  { %107 = vst [vmem:[#allocation1 + $0x10] ss:$2 sm:$0xff] %v84_v26  ;;  %v5588_v40 = vpack.c.bf16 %v101_v36, %v101_v36  ;;  %v5196_v42 = vld [vmem:[#allocation5 + $0x64c] sm:$0xf0]  ;;  %v4304_v45 = vld [vmem:[#allocation5 + $0x740] sm:$0xf]  ;;  %v4049_v52 = vor.u32 %v5164_v33, %v4048_v32  ;;  %2466 = vmatpush.bf16.msrb.mxu0 %v3921_v48 }
  0x4c   :  { %v99_v44 = vld.sshfl [vmem:[#allocation1 + $0x8] sm:$0xff pattern:$0x75316420]  ;;  %v3904_v49 = vld [vmem:[#allocation5 + $0x420] sm:$0xf]  ;;  %v4177_v53 = vor.u32 %v5196_v42, %v4176_v34  ;;  %2417 = vmatmul.bf16.vlgmr.msra.gmra.mxu0 %v5590_v43 }
  0x4d   :  { %v5228_v46 = vld [vmem:[#allocation5 + $0x74c] sm:$0xf0]  ;;  %2456 = vmatmul.bf16.vlgmr.msra.gmra.mxu3 %v5588_v40  ;;  %106 = vst [vmem:[#allocation1] ss:$2 sm:$0xff] %v83_v29  ;;  %v5594_v47 = vpack.c.bf16 %v99_v44, %v99_v44  ;;  %v4032_v54 = vld [vmem:[#allocation5 + $0x520] sm:$0xf]  ;;  %2479 = vmatpush.bf16.msrb.mxu1 %v4049_v52 }
  0x4e   :  { %v5128_v50 = vld [vmem:[#allocation5 + $0x42c] sm:$0xf0]  ;;  %v5596_v56 = vld [vmem:[#allocation5 + $0xba0] sm:$0x11]  ;;  %v4305_v57 = vor.u32 %v5228_v46, %v4304_v45  ;;  %2492 = vmatpush.bf16.msrb.mxu2 %v4177_v53 }
  0x4f   :  { %v5160_v55 = vld [vmem:[#allocation5 + $0x52c] sm:$0xf0]  ;;  %v4160_v58 = vld [vmem:[#allocation5 + $0x620] sm:$0xf]  ;;  %2430 = vmatmul.bf16.vlgmr.msra.gmra.mxu1 %v5594_v47  ;;  %v3905_v63 = vor.u32 %v5128_v50, %v3904_v49  ;;  %v1638_v3 = vunpack.c.l.b16 %v5596_v56 }
  0x50   :  { %v5192_v59 = vld [vmem:[#allocation5 + $0x62c] sm:$0xf0]  ;;  %v4288_v60 = vld [vmem:[#allocation5 + $0x720] sm:$0xf]  ;;  %v4033_v4 = vor.u32 %v5160_v55, %v4032_v54  ;;  %2505 = vmatpush.bf16.msrb.mxu3 %v4305_v57 }
  0x51   :  { %v5224_v61 = vld [vmem:[#allocation5 + $0x72c] sm:$0xf0]  ;;  %v3888_v62 = vld [vmem:[#allocation5 + $0x400] sm:$0xf]  ;;  %v4161_v5 = vor.u32 %v5192_v59, %v4160_v58  ;;  %2467 = vmatpush.bf16.msrb.mxu0 %v3905_v63  ;;  %v2014_v19 = vpack.c.b16 %v1638_v3, %v1638_v3 }
  0x52   :  { %v5124_v0 = vld [vmem:[#allocation5 + $0x40c] sm:$0xf0]  ;;  %v4016_v1 = vld [vmem:[#allocation5 + $0x500] sm:$0xf]  ;;  %v4289_v9 = vor.u32 %v5224_v61, %v4288_v60  ;;  %2480 = vmatpush.bf16.msrb.mxu1 %v4033_v4 }
  0x53   :  { %v5156_v2 = vld [vmem:[#allocation5 + $0x50c] sm:$0xf0]  ;;  %v4144_v6 = vld [vmem:[#allocation5 + $0x600] sm:$0xf]  ;;  %v3889_v15 = vor.u32 %v5124_v0, %v3888_v62  ;;  %2493 = vmatpush.bf16.msrb.mxu2 %v4161_v5  ;;  %v2398_v33 = vand.u32 %v5602_v23, %v2014_v19 }
  0x54   :  { %v5188_v7 = vld [vmem:[#allocation5 + $0x60c] sm:$0xf0]  ;;  %v4272_v8 = vld [vmem:[#allocation5 + $0x700] sm:$0xf]  ;;  %v4017_v20 = vor.u32 %v5156_v2, %v4016_v1  ;;  %2506 = vmatpush.bf16.msrb.mxu3 %v4289_v9 }
  0x55   :  { %v5220_v10 = vld [vmem:[#allocation5 + $0x70c] sm:$0xf0]  ;;  %v4512_v11 = vld [vmem:[#allocation5 + $0x8e0] sm:$0xf]  ;;  %v4145_v21 = vor.u32 %v5188_v7, %v4144_v6  ;;  %2468 = vmatpush.bf16.msrb.mxu0 %v3889_v15 }
  0x56   :  { %v81_v12 = vld [vmem:[#allocation2 + $0x10] sm:$0xff]  ;;  %v5280_v13 = vld [vmem:[#allocation5 + $0x8ec] sm:$0xf0]  ;;  %v4273_v24 = vor.u32 %v5220_v10, %v4272_v8  ;;  %v104_v26 = vld.sshfl [vmem:[#allocation1 + $0x30] sm:$0xff pattern:$0x75316420]  ;;  %2481 = vmatpush.bf16.msrb.mxu1 %v4017_v20 }
  0x57   :  { %v4640_v14 = vld [vmem:[#allocation5 + $0x9e0] sm:$0xf]  ;;  %95 = vst [vmem:[#allocation1 + $0x20] ss:$2 sm:$0xff] %v81_v12  ;;  %v5312_v16 = vld [vmem:[#allocation5 + $0x9ec] sm:$0xf0]  ;;  %v4513_v25 = vor.u32 %v5280_v13, %v4512_v11  ;;  %v5605_v37 = vpack.c.bf16 %v104_v26, %v104_v26  ;;  %2494 = vmatpush.bf16.msrb.mxu2 %v4145_v21 }
  0x58   :  { %v4768_v17 = vld [vmem:[#allocation5 + $0xae0] sm:$0xf]  ;;  %v5344_v18 = vld [vmem:[#allocation5 + $0xaec] sm:$0xf0]  ;;  %v4641_v28 = vor.u32 %v5312_v16, %v4640_v14  ;;  %2507 = vmatpush.bf16.msrb.mxu3 %v4273_v24 }
  0x59   :  { %v105_v27 = vld.sshfl [vmem:[#allocation1 + $0x38] sm:$0xff pattern:$0x75316420]  ;;  %v4769_v29 = vor.u32 %v5344_v18, %v4768_v17  ;;  %v5276_v31 = vld [vmem:[#allocation5 + $0x8cc] sm:$0xf0]  ;;  %2513 = vmatpush.bf16.msra.mxu0 %v4513_v25 }
  0x5a   :  { %v4496_v30 = vld [vmem:[#allocation5 + $0x8c0] sm:$0xf]  ;;  %v5308_v34 = vld [vmem:[#allocation5 + $0x9cc] sm:$0xf0]  ;;  %v5607_v42 = vpack.c.bf16 %v105_v27, %v105_v27  ;;  %2526 = vmatpush.bf16.msra.mxu1 %v4641_v28  ;;  %2495 = vmatmul.bf16.vlgmr.msrb.gmra.mxu2 %v5605_v37 }
  0x5b   :  { %v4624_v32 = vld [vmem:[#allocation5 + $0x9c0] sm:$0xf]  ;;  %v5340_v36 = vld [vmem:[#allocation5 + $0xacc] sm:$0xf0]  ;;  %v4497_v44 = vor.u32 %v5276_v31, %v4496_v30  ;;  %2539 = vmatpush.bf16.msra.mxu2 %v4769_v29 }
  0x5c   :  { %v4752_v35 = vld [vmem:[#allocation5 + $0xac0] sm:$0xf]  ;;  %v5364_v41 = vld [vmem:[#allocation5 + $0xb8c] sm:$0xf0]  ;;  %v4625_v48 = vor.u32 %v5308_v34, %v4624_v32  ;;  %2554 = vmatpush.bf16.msra.mxu3 %v2398_v33 }
  0x5d   :  { %v4848_v39 = vld [vmem:[#allocation5 + $0xb80] sm:$0xf]  ;;  %v4753_v49 = vor.u32 %v5340_v36, %v4752_v35  ;;  %v5272_v51 = vld [vmem:[#allocation5 + $0x8ac] sm:$0xf0]  ;;  %2508 = vmatmul.bf16.vlgmr.msrb.gmra.mxu3 %v5607_v42  ;;  %2514 = vmatpush.bf16.msra.mxu0 %v4497_v44  ;;  %v5022_v36 = vld [vmem:[#allocation5 + $0xe4] sm:$0xf] }
  0x5e   :  { %v102_v45 = vld.sshfl [vmem:[#allocation1 + $0x20] sm:$0xff pattern:$0x75316420]  ;;  %v103_v46 = vld.sshfl [vmem:[#allocation1 + $0x28] sm:$0xff pattern:$0x75316420]  ;;  %v4849_v53 = vor.u32 %v5364_v41, %v4848_v39  ;;  %2527 = vmatpush.bf16.msra.mxu1 %v4625_v48 }
  0x5f   :  { %v4480_v50 = vld [vmem:[#allocation5 + $0x8a0] sm:$0xf]  ;;  %v5304_v54 = vld [vmem:[#allocation5 + $0x9ac] sm:$0xf0]  ;;  %v5610_v58 = vpack.c.bf16 %v102_v45, %v102_v45  ;;  %v5613_v61 = vpack.c.bf16 %v103_v46, %v103_v46  ;;  %2540 = vmatpush.bf16.msra.mxu2 %v4753_v49  ;;  %v3490_v39 = vld [vmem:[#allocation5 + $0xf0] sm:$0xf0] }
  0x60   :  { %v4608_v52 = vld [vmem:[#allocation5 + $0x9a0] sm:$0xf]  ;;  %v5336_v57 = vld [vmem:[#allocation5 + $0xaac] sm:$0xf0]  ;;  %v4481_v62 = vor.u32 %v5272_v51, %v4480_v50  ;;  %2555 = vmatpush.bf16.msra.mxu3 %v4849_v53  ;;  %v5018_v53 = vld [vmem:[#allocation5 + $0xc4] sm:$0xf] }
  0x61   :  { %v4736_v55 = vld [vmem:[#allocation5 + $0xaa0] sm:$0xf]  ;;  %v5360_v60 = vld [vmem:[#allocation5 + $0xb6c] sm:$0xf0]  ;;  %v4609_v63 = vor.u32 %v5304_v54, %v4608_v52  ;;  %2469 = vmatmul.bf16.vlgmr.msrb.gmra.mxu0 %v5610_v58  ;;  %2482 = vmatmul.bf16.vlgmr.msrb.gmra.mxu1 %v5613_v61  ;;  %v3493_v54 = vor.u32 %v5022_v36, %v3490_v39 }
  0x62   :  { %v4832_v59 = vld [vmem:[#allocation5 + $0xb60] sm:$0xf]  ;;  %v4737_v0 = vor.u32 %v5336_v57, %v4736_v55  ;;  %v5268_v2 = vld [vmem:[#allocation5 + $0x88c] sm:$0xf0]  ;;  %2515 = vmatpush.bf16.msra.mxu0 %v4481_v62  ;;  %v3474_v55 = vld [vmem:[#allocation5 + $0xd0] sm:$0xf0] }
  0x63   :  { %v4464_v1 = vld [vmem:[#allocation5 + $0x880] sm:$0xf]  ;;  %v4833_v4 = vor.u32 %v5360_v60, %v4832_v59  ;;  %v5300_v5 = vld [vmem:[#allocation5 + $0x98c] sm:$0xf0]  ;;  %2528 = vmatpush.bf16.msra.mxu1 %v4609_v63 }
  0x64   :  { %v4592_v3 = vld [vmem:[#allocation5 + $0x980] sm:$0xf]  ;;  %v5332_v7 = vld [vmem:[#allocation5 + $0xa8c] sm:$0xf0]  ;;  %v4465_v10 = vor.u32 %v5268_v2, %v4464_v1  ;;  %2541 = vmatpush.bf16.msra.mxu2 %v4737_v0 }
  0x65   :  { %v4720_v6 = vld [vmem:[#allocation5 + $0xa80] sm:$0xf]  ;;  %v5356_v9 = vld [vmem:[#allocation5 + $0xb4c] sm:$0xf0]  ;;  %v4593_v11 = vor.u32 %v5300_v5, %v4592_v3  ;;  %2556 = vmatpush.bf16.msra.mxu3 %v4833_v4  ;;  %v5014_v5 = vld [vmem:[#allocation5 + $0xa4] sm:$0xf] }
  0x66   :  { %v4816_v8 = vld [vmem:[#allocation5 + $0xb40] sm:$0xf]  ;;  %v4721_v12 = vor.u32 %v5332_v7, %v4720_v6  ;;  %v5264_v14 = vld [vmem:[#allocation5 + $0x86c] sm:$0xf0]  ;;  %2516 = vmatpush.bf16.msra.mxu0 %v4465_v10  ;;  %v3458_v6 = vld [vmem:[#allocation5 + $0xb0] sm:$0xf0] }
  0x67   :  { %v4448_v13 = vld [vmem:[#allocation5 + $0x860] sm:$0xf]  ;;  %v4817_v16 = vor.u32 %v5356_v9, %v4816_v8  ;;  %v5296_v17 = vld [vmem:[#allocation5 + $0x96c] sm:$0xf0]  ;;  %2529 = vmatpush.bf16.msra.mxu1 %v4593_v11  ;;  %v5054_v7 = vld [vmem:[#allocation5 + $0x1e4] sm:$0xf]  ;;  %v3477_v11 = vor.u32 %v5018_v53, %v3474_v55 }
  0x68   :  { %v4576_v15 = vld [vmem:[#allocation5 + $0x960] sm:$0xf]  ;;  %v5328_v19 = vld [vmem:[#allocation5 + $0xa6c] sm:$0xf0]  ;;  %v4449_v22 = vor.u32 %v5264_v14, %v4448_v13  ;;  %2542 = vmatpush.bf16.msra.mxu2 %v4721_v12  ;;  %v3618_v8 = vld [vmem:[#allocation5 + $0x1f0] sm:$0xf0] }
  0x69   :  { %v4704_v18 = vld [vmem:[#allocation5 + $0xa60] sm:$0xf]  ;;  %v5352_v21 = vld [vmem:[#allocation5 + $0xb2c] sm:$0xf0]  ;;  %v4577_v24 = vor.u32 %v5296_v17, %v4576_v15  ;;  %2557 = vmatpush.bf16.msra.mxu3 %v4817_v16  ;;  %v5086_v9 = vld [vmem:[#allocation5 + $0x2e4] sm:$0xf] }
  0x6a   :  { %v4800_v20 = vld [vmem:[#allocation5 + $0xb20] sm:$0xf]  ;;  %v4705_v25 = vor.u32 %v5328_v19, %v4704_v18  ;;  %v5260_v27 = vld [vmem:[#allocation5 + $0x84c] sm:$0xf0]  ;;  %2517 = vmatpush.bf16.msra.mxu0 %v4449_v22  ;;  %v3746_v12 = vld [vmem:[#allocation5 + $0x2f0] sm:$0xf0] }
  0x6b   :  { %v4432_v26 = vld [vmem:[#allocation5 + $0x840] sm:$0xf]  ;;  %v4801_v29 = vor.u32 %v5352_v21, %v4800_v20  ;;  %v5292_v30 = vld [vmem:[#allocation5 + $0x94c] sm:$0xf0]  ;;  %2530 = vmatpush.bf16.msra.mxu1 %v4577_v24  ;;  %v5118_v13 = vld [vmem:[#allocation5 + $0x3e4] sm:$0xf]  ;;  %v3621_v21 = vor.u32 %v5054_v7, %v3618_v8  ;;  %v3749_v22 = vor.u32 %v5086_v9, %v3746_v12 }
  0x6c   :  { %v4560_v28 = vld [vmem:[#allocation5 + $0x940] sm:$0xf]  ;;  %v5324_v32 = vld [vmem:[#allocation5 + $0xa4c] sm:$0xf0]  ;;  %v4433_v35 = vor.u32 %v5260_v27, %v4432_v26  ;;  %2543 = vmatpush.bf16.msra.mxu2 %v4705_v25  ;;  %v3874_v15 = vld [vmem:[#allocation5 + $0x3f0] sm:$0xf0]  ;;  %v3461_v26 = vor.u32 %v5014_v5, %v3458_v6 }
  0x6d   :  { %v4688_v31 = vld [vmem:[#allocation5 + $0xa40] sm:$0xf]  ;;  %v5348_v34 = vld [vmem:[#allocation5 + $0xb0c] sm:$0xf0]  ;;  %v4561_v44 = vor.u32 %v5292_v30, %v4560_v28  ;;  %2558 = vmatpush.bf16.msra.mxu3 %v4801_v29  ;;  %v5010_v24 = vld [vmem:[#allocation5 + $0x84] sm:$0xf]  ;;  %v3877_v27 = vor.u32 %v5118_v13, %v3874_v15 }
  0x6e   :  { %v4784_v33 = vld [vmem:[#allocation5 + $0xb00] sm:$0xf]  ;;  %v4689_v45 = vor.u32 %v5324_v32, %v4688_v31  ;;  %v5256_v46 = vld [vmem:[#allocation5 + $0x82c] sm:$0xf0]  ;;  %2518 = vmatpush.bf16.msra.mxu0 %v4433_v35  ;;  %v5050_v25 = vld [vmem:[#allocation5 + $0x1c4] sm:$0xf] }
  0x6f   :  { %v4416_v41 = vld [vmem:[#allocation5 + $0x820] sm:$0xf]  ;;  %v5288_v49 = vld [vmem:[#allocation5 + $0x92c] sm:$0xf0]  ;;  %v4785_v50 = vor.u32 %v5348_v34, %v4784_v33  ;;  %2531 = vmatpush.bf16.msra.mxu1 %v4561_v44  ;;  %v3602_v28 = vld [vmem:[#allocation5 + $0x1d0] sm:$0xf0] }
  0x70   :  { %v4544_v48 = vld [vmem:[#allocation5 + $0x920] sm:$0xf]  ;;  %v5320_v52 = vld [vmem:[#allocation5 + $0xa2c] sm:$0xf0]  ;;  %v4417_v59 = vor.u32 %v5256_v46, %v4416_v41  ;;  %2544 = vmatpush.bf16.msra.mxu2 %v4689_v45  ;;  %v5082_v29 = vld [vmem:[#allocation5 + $0x2c4] sm:$0xf]  ;;  %v3605_v39 = vor.u32 %v5050_v25, %v3602_v28 }
  0x71   :  { %v4672_v51 = vld [vmem:[#allocation5 + $0xa20] sm:$0xf]  ;;  %v5252_v62 = vld [vmem:[#allocation5 + $0x80c] sm:$0xf0]  ;;  %v4545_v0 = vor.u32 %v5288_v49, %v4544_v48  ;;  %2559 = vmatpush.bf16.msra.mxu3 %v4785_v50  ;;  %v3730_v30 = vld [vmem:[#allocation5 + $0x2d0] sm:$0xf0] }
  0x72   :  { %v111_v57 = vld.sshfl [vmem:[#allocation1 + $0x18] sm:$0xff pattern:$0x75316420]  ;;  %v4673_v1 = vor.u32 %v5320_v52, %v4672_v51  ;;  %v5284_v2 = vld [vmem:[#allocation5 + $0x90c] sm:$0xf0]  ;;  %2519 = vmatpush.bf16.msra.mxu0 %v4417_v59  ;;  %v3733_v41 = vor.u32 %v5082_v29, %v3730_v30 }
  0x73   :  { %v4400_v60 = vld [vmem:[#allocation5 + $0x800] sm:$0xf]  ;;  %v5316_v4 = vld [vmem:[#allocation5 + $0xa0c] sm:$0xf0]  ;;  %v5617_v10 = vpack.c.bf16 %v111_v57, %v111_v57  ;;  %2532 = vmatpush.bf16.msra.mxu1 %v4545_v0  ;;  %v3442_v33 = vld [vmem:[#allocation5 + $0x90] sm:$0xf0] }
  0x74   :  { %v4528_v63 = vld [vmem:[#allocation5 + $0x900] sm:$0xf]  ;;  %v4401_v14 = vor.u32 %v5252_v62, %v4400_v60  ;;  %v108_v16 = vld.sshfl [vmem:[#allocation1] sm:$0xff pattern:$0x75316420]  ;;  %2545 = vmatpush.bf16.msra.mxu2 %v4673_v1  ;;  %v3445_v46 = vor.u32 %v5010_v24, %v3442_v33 }
  0x75   :  { %v4656_v3 = vld [vmem:[#allocation5 + $0xa00] sm:$0xf]  ;;  %2565 = vmatpush.bf16.msrb.mxu3 %v3493_v54  ;;  %v4529_v17 = vor.u32 %v5284_v2, %v4528_v63  ;;  %v110_v19 = vld.sshfl [vmem:[#allocation1 + $0x10] sm:$0xff pattern:$0x75316420]  ;;  %v5621_v31 = vpack.c.bf16 %v108_v16, %v108_v16 }
  0x76   :  { %v4657_v18 = vor.u32 %v5316_v4, %v4656_v3  ;;  %v109_v20 = vld.sshfl [vmem:[#allocation1 + $0x8] sm:$0xff pattern:$0x75316420]  ;;  %4862 = vmatmul.msk.bf16.vlgmr.msra.gmra.mxu3 %vm2390_vm1, %v5617_v10  ;;  %2520 = vmatpush.bf16.msra.mxu0 %v4401_v14  ;;  %v5623_v32 = vpack.c.bf16 %v110_v19, %v110_v19  ;;  %v5114_v34 = vld [vmem:[#allocation5 + $0x3c4] sm:$0xf] }
  0x77   :  { %v3858_v35 = vld [vmem:[#allocation5 + $0x3d0] sm:$0xf0]  ;;  %2533 = vmatpush.bf16.msra.mxu1 %v4529_v17  ;;  %v5625_v36 = vpack.c.bf16 %v109_v20, %v109_v20  ;;  %v5006_v44 = vld [vmem:[#allocation5 + $0x64] sm:$0xf] }
  0x78   :  { %2546 = vmatpush.bf16.msra.mxu2 %v4657_v18  ;;  %v5046_v45 = vld [vmem:[#allocation5 + $0x1a4] sm:$0xf]  ;;  %v3861_v48 = vor.u32 %v5114_v34, %v3858_v35  ;;  %v3586_v49 = vld [vmem:[#allocation5 + $0x1b0] sm:$0xf0] }
  0x79   :  { %2566 = vmatpush.bf16.msrb.mxu3 %v3477_v11  ;;  %v5078_v50 = vld [vmem:[#allocation5 + $0x2a4] sm:$0xf]  ;;  %v3714_v51 = vld [vmem:[#allocation5 + $0x2b0] sm:$0xf0]  ;;  %2521 = vmatmul.bf16.vlgmr.msra.gmra.mxu0 %v5621_v31  ;;  %v3589_v55 = vor.u32 %v5046_v45, %v3586_v49 }
  0x7a   :  { %2578 = vmatpush.bf16.msrb.mxu0 %v3621_v21  ;;  %v3426_v52 = vld [vmem:[#allocation5 + $0x70] sm:$0xf0]  ;;  %v5110_v53 = vld [vmem:[#allocation5 + $0x3a4] sm:$0xf]  ;;  %2534 = vmatmul.bf16.vlgmr.msra.gmra.mxu1 %v5625_v36  ;;  %v3717_v57 = vor.u32 %v5078_v50, %v3714_v51 }
  0x7b   :  { %2591 = vmatpush.bf16.msrb.mxu1 %v3749_v22  ;;  %2547 = vmatmul.bf16.vlgmr.msra.gmra.mxu2 %v5623_v32  ;;  %v3842_v54 = vld [vmem:[#allocation5 + $0x3b0] sm:$0xf0]  ;;  %v5002_v59 = vld [vmem:[#allocation5 + $0x44] sm:$0xf]  ;;  %v3429_v62 = vor.u32 %v5006_v44, %v3426_v52 }
  0x7c   :  { %2604 = vmatpush.bf16.msrb.mxu2 %v3877_v27  ;;  %v5042_v60 = vld [vmem:[#allocation5 + $0x184] sm:$0xf]  ;;  %v3845_v63 = vor.u32 %v5110_v53, %v3842_v54  ;;  %v3570_v0 = vld [vmem:[#allocation5 + $0x190] sm:$0xf0] }
  0x7d   :  { %2567 = vmatpush.bf16.msrb.mxu3 %v3461_v26  ;;  %v5074_v1 = vld [vmem:[#allocation5 + $0x284] sm:$0xf]  ;;  %v3698_v2 = vld [vmem:[#allocation5 + $0x290] sm:$0xf0]  ;;  %v3573_v6 = vor.u32 %v5042_v60, %v3570_v0 }
  0x7e   :  { %2579 = vmatpush.bf16.msrb.mxu0 %v3605_v39  ;;  %v3410_v3 = vld [vmem:[#allocation5 + $0x50] sm:$0xf0]  ;;  %v5106_v4 = vld [vmem:[#allocation5 + $0x384] sm:$0xf]  ;;  %v3701_v7 = vor.u32 %v5074_v1, %v3698_v2 }
  0x7f   :  { %2592 = vmatpush.bf16.msrb.mxu1 %v3733_v41  ;;  %v3826_v5 = vld [vmem:[#allocation5 + $0x390] sm:$0xf0]  ;;  %v4998_v8 = vld [vmem:[#allocation5 + $0x24] sm:$0xf]  ;;  %v3413_v11 = vor.u32 %v5002_v59, %v3410_v3 }
  0x80   :  { %2605 = vmatpush.bf16.msrb.mxu2 %v3861_v48  ;;  %v5038_v9 = vld [vmem:[#allocation5 + $0x164] sm:$0xf]  ;;  %v3829_v12 = vor.u32 %v5106_v4, %v3826_v5  ;;  %v3554_v13 = vld [vmem:[#allocation5 + $0x170] sm:$0xf0] }
  0x81   :  { %2568 = vmatpush.bf16.msrb.mxu3 %v3445_v46  ;;  %v5070_v14 = vld [vmem:[#allocation5 + $0x264] sm:$0xf]  ;;  %v3682_v15 = vld [vmem:[#allocation5 + $0x270] sm:$0xf0]  ;;  %v3557_v19 = vor.u32 %v5038_v9, %v3554_v13 }
  0x82   :  { %2580 = vmatpush.bf16.msrb.mxu0 %v3589_v55  ;;  %v3394_v16 = vld [vmem:[#allocation5 + $0x30] sm:$0xf0]  ;;  %v5102_v17 = vld [vmem:[#allocation5 + $0x364] sm:$0xf]  ;;  %v3685_v20 = vor.u32 %v5070_v14, %v3682_v15 }
  0x83   :  { %2593 = vmatpush.bf16.msrb.mxu1 %v3717_v57  ;;  %v3810_v18 = vld [vmem:[#allocation5 + $0x370] sm:$0xf0]  ;;  %v4994_v21 = vld [vmem:[#allocation5 + $0x4] sm:$0xf]  ;;  %v3397_v24 = vor.u32 %v4998_v8, %v3394_v16 }
  0x84   :  { %2606 = vmatpush.bf16.msrb.mxu2 %v3845_v63  ;;  %v5034_v22 = vld [vmem:[#allocation5 + $0x144] sm:$0xf]  ;;  %v3813_v25 = vor.u32 %v5102_v17, %v3810_v18  ;;  %v3538_v26 = vld [vmem:[#allocation5 + $0x150] sm:$0xf0] }
  0x85   :  { %2569 = vmatpush.bf16.msrb.mxu3 %v3429_v62  ;;  %v5066_v27 = vld [vmem:[#allocation5 + $0x244] sm:$0xf]  ;;  %v3666_v28 = vld [vmem:[#allocation5 + $0x250] sm:$0xf0]  ;;  %v3541_v39 = vor.u32 %v5034_v22, %v3538_v26 }
  0x86   :  { %2581 = vmatpush.bf16.msrb.mxu0 %v3573_v6  ;;  %v3378_v29 = vld [vmem:[#allocation5 + $0x10] sm:$0xf0]  ;;  %v5098_v30 = vld [vmem:[#allocation5 + $0x344] sm:$0xf]  ;;  %v3669_v41 = vor.u32 %v5066_v27, %v3666_v28 }
  0x87   :  { %2594 = vmatpush.bf16.msrb.mxu1 %v3701_v7  ;;  %v3794_v33 = vld [vmem:[#allocation5 + $0x350] sm:$0xf0]  ;;  %v5150_v34 = vld [vmem:[#allocation5 + $0x4e4] sm:$0xf]  ;;  %v3381_v45 = vor.u32 %v4994_v21, %v3378_v29 }
  0x88   :  { %2607 = vmatpush.bf16.msrb.mxu2 %v3829_v12  ;;  %v4002_v35 = vld [vmem:[#allocation5 + $0x4f0] sm:$0xf0]  ;;  %v5030_v44 = vld [vmem:[#allocation5 + $0x124] sm:$0xf]  ;;  %v3797_v46 = vor.u32 %v5098_v30, %v3794_v33 }
  0x89   :  { %2570 = vmatpush.bf16.msrb.mxu3 %v3413_v11  ;;  %v3522_v48 = vld [vmem:[#allocation5 + $0x130] sm:$0xf0]  ;;  %v5062_v49 = vld [vmem:[#allocation5 + $0x224] sm:$0xf]  ;;  %v4005_v51 = vor.u32 %v5150_v34, %v4002_v35 }
  0x8a   :  { %2582 = vmatpush.bf16.msrb.mxu0 %v3557_v19  ;;  %v3650_v50 = vld [vmem:[#allocation5 + $0x230] sm:$0xf0]  ;;  %v5094_v52 = vld [vmem:[#allocation5 + $0x324] sm:$0xf]  ;;  %v3525_v57 = vor.u32 %v5030_v44, %v3522_v48 }
  0x8b   :  { %2595 = vmatpush.bf16.msrb.mxu1 %v3685_v20  ;;  %v3778_v53 = vld [vmem:[#allocation5 + $0x330] sm:$0xf0]  ;;  %v5146_v54 = vld [vmem:[#allocation5 + $0x4c4] sm:$0xf]  ;;  %v3653_v59 = vor.u32 %v5062_v49, %v3650_v50 }
  0x8c   :  { %2608 = vmatpush.bf16.msrb.mxu2 %v3813_v25  ;;  %v3986_v55 = vld [vmem:[#allocation5 + $0x4d0] sm:$0xf0]  ;;  %v5026_v60 = vld [vmem:[#allocation5 + $0x104] sm:$0xf]  ;;  %v3781_v0 = vor.u32 %v5094_v52, %v3778_v53 }
  0x8d   :  { %2571 = vmatpush.bf16.msrb.mxu3 %v3397_v24  ;;  %v3506_v62 = vld [vmem:[#allocation5 + $0x110] sm:$0xf0]  ;;  %v5058_v63 = vld [vmem:[#allocation5 + $0x204] sm:$0xf]  ;;  %v3989_v4 = vor.u32 %v5146_v54, %v3986_v55 }
  0x8e   :  { %2583 = vmatpush.bf16.msrb.mxu0 %v3541_v39  ;;  %v3634_v1 = vld [vmem:[#allocation5 + $0x210] sm:$0xf0]  ;;  %v5090_v2 = vld [vmem:[#allocation5 + $0x304] sm:$0xf]  ;;  %v3509_v12 = vor.u32 %v5026_v60, %v3506_v62 }
  0x8f   :  { %2596 = vmatpush.bf16.msrb.mxu1 %v3669_v41  ;;  %v3762_v3 = vld [vmem:[#allocation5 + $0x310] sm:$0xf0]  ;;  %v5142_v5 = vld [vmem:[#allocation5 + $0x4a4] sm:$0xf]  ;;  %v3637_v13 = vor.u32 %v5058_v63, %v3634_v1 }
  0x90   :  { %2609 = vmatpush.bf16.msrb.mxu2 %v3797_v46  ;;  %v5182_v6 = vld [vmem:[#allocation5 + $0x5e4] sm:$0xf]  ;;  %v4130_v7 = vld [vmem:[#allocation5 + $0x5f0] sm:$0xf0]  ;;  %v3765_v16 = vor.u32 %v5090_v2, %v3762_v3 }
  0x91   :  { %2572 = vmatpush.bf16.msrb.mxu3 %v3381_v45  ;;  %v3970_v8 = vld [vmem:[#allocation5 + $0x4b0] sm:$0xf0]  ;;  %v5214_v9 = vld [vmem:[#allocation5 + $0x6e4] sm:$0xf]  ;;  %v4133_v17 = vor.u32 %v5182_v6, %v4130_v7 }
  0x92   :  { %v4258_v11 = vld [vmem:[#allocation5 + $0x6f0] sm:$0xf0]  ;;  %2584 = vmatpush.bf16.msrb.mxu0 %v3525_v57  ;;  %v5246_v14 = vld [vmem:[#allocation5 + $0x7e4] sm:$0xf]  ;;  %v3973_v18 = vor.u32 %v5142_v5, %v3970_v8 }
  0x93   :  { %2597 = vmatpush.bf16.msrb.mxu1 %v3653_v59  ;;  %v4386_v15 = vld [vmem:[#allocation5 + $0x7f0] sm:$0xf0]  ;;  %v4261_v19 = vor.u32 %v5214_v9, %v4258_v11  ;;  %v5138_v20 = vld [vmem:[#allocation5 + $0x484] sm:$0xf] }
  0x94   :  { %2610 = vmatpush.bf16.msrb.mxu2 %v3781_v0  ;;  %2573 = vmatmul.bf16.vlgmr.msrb.gmra.mxu3 %v5590_v43  ;;  %v5178_v21 = vld [vmem:[#allocation5 + $0x5c4] sm:$0xf]  ;;  %v4114_v22 = vld [vmem:[#allocation5 + $0x5d0] sm:$0xf0]  ;;  %v4389_v24 = vor.u32 %v5246_v14, %v4386_v15 }
  0x95   :  { %2617 = vmatpush.bf16.msra.mxu3 %v4005_v51  ;;  %v3954_v25 = vld [vmem:[#allocation5 + $0x490] sm:$0xf0]  ;;  %v5210_v26 = vld [vmem:[#allocation5 + $0x6c4] sm:$0xf]  ;;  %v4117_v30 = vor.u32 %v5178_v21, %v4114_v22 }
  0x96   :  { %v4242_v27 = vld [vmem:[#allocation5 + $0x6d0] sm:$0xf0]  ;;  %2585 = vmatpush.bf16.msrb.mxu0 %v3509_v12  ;;  %v5242_v28 = vld [vmem:[#allocation5 + $0x7c4] sm:$0xf]  ;;  %v3957_v33 = vor.u32 %v5138_v20, %v3954_v25 }
  0x97   :  { %2598 = vmatpush.bf16.msrb.mxu1 %v3637_v13  ;;  %v4370_v29 = vld [vmem:[#allocation5 + $0x7d0] sm:$0xf0]  ;;  %v4245_v34 = vor.u32 %v5210_v26, %v4242_v27  ;;  %v5134_v35 = vld [vmem:[#allocation5 + $0x464] sm:$0xf] }
  0x98   :  { %2611 = vmatpush.bf16.msrb.mxu2 %v3765_v16  ;;  %v5174_v39 = vld [vmem:[#allocation5 + $0x5a4] sm:$0xf]  ;;  %v4098_v41 = vld [vmem:[#allocation5 + $0x5b0] sm:$0xf0]  ;;  %v4373_v44 = vor.u32 %v5242_v28, %v4370_v29 }
  0x99   :  { %2618 = vmatpush.bf16.msra.mxu3 %v3989_v4  ;;  %v3938_v45 = vld [vmem:[#allocation5 + $0x470] sm:$0xf0]  ;;  %v5206_v46 = vld [vmem:[#allocation5 + $0x6a4] sm:$0xf]  ;;  %2586 = vmatmul.bf16.vlgmr.msrb.gmra.mxu0 %v5594_v47  ;;  %v4101_v51 = vor.u32 %v5174_v39, %v4098_v41 }
  0x9a   :  { %2630 = vmatpush.bf16.msra.mxu0 %v4133_v17  ;;  %v4226_v48 = vld [vmem:[#allocation5 + $0x6b0] sm:$0xf0]  ;;  %v5238_v49 = vld [vmem:[#allocation5 + $0x7a4] sm:$0xf]  ;;  %2599 = vmatmul.bf16.vlgmr.msrb.gmra.mxu1 %v5586_v38  ;;  %v3941_v52 = vor.u32 %v5134_v35, %v3938_v45 }
  0x9b   :  { %2643 = vmatpush.bf16.msra.mxu1 %v4261_v19  ;;  %v4354_v50 = vld [vmem:[#allocation5 + $0x7b0] sm:$0xf0]  ;;  %2612 = vmatmul.bf16.vlgmr.msrb.gmra.mxu2 %v5588_v40  ;;  %v4229_v53 = vor.u32 %v5206_v46, %v4226_v48  ;;  %v5130_v54 = vld [vmem:[#allocation5 + $0x444] sm:$0xf] }
  0x9c   :  { %2656 = vmatpush.bf16.msra.mxu2 %v4389_v24  ;;  %v5170_v55 = vld [vmem:[#allocation5 + $0x584] sm:$0xf]  ;;  %v4082_v57 = vld [vmem:[#allocation5 + $0x590] sm:$0xf0]  ;;  %v4357_v59 = vor.u32 %v5238_v49, %v4354_v50 }
  0x9d   :  { %2619 = vmatpush.bf16.msra.mxu3 %v3973_v18  ;;  %v3922_v60 = vld [vmem:[#allocation5 + $0x450] sm:$0xf0]  ;;  %v5202_v62 = vld [vmem:[#allocation5 + $0x684] sm:$0xf]  ;;  %v4085_v2 = vor.u32 %v5170_v55, %v4082_v57 }
  0x9e   :  { %2631 = vmatpush.bf16.msra.mxu0 %v4117_v30  ;;  %v4210_v63 = vld [vmem:[#allocation5 + $0x690] sm:$0xf0]  ;;  %v5234_v0 = vld [vmem:[#allocation5 + $0x784] sm:$0xf]  ;;  %v3925_v3 = vor.u32 %v5130_v54, %v3922_v60 }
  0x9f   :  { %2644 = vmatpush.bf16.msra.mxu1 %v4245_v34  ;;  %v4338_v1 = vld [vmem:[#allocation5 + $0x790] sm:$0xf0]  ;;  %v4213_v4 = vor.u32 %v5202_v62, %v4210_v63  ;;  %v5126_v5 = vld [vmem:[#allocation5 + $0x424] sm:$0xf] }
  0xa0   :  { %2657 = vmatpush.bf16.msra.mxu2 %v4373_v44  ;;  %v5166_v6 = vld [vmem:[#allocation5 + $0x564] sm:$0xf]  ;;  %v4066_v7 = vld [vmem:[#allocation5 + $0x570] sm:$0xf0]  ;;  %v4341_v8 = vor.u32 %v5234_v0, %v4338_v1 }
  0xa1   :  { %2620 = vmatpush.bf16.msra.mxu3 %v3957_v33  ;;  %v3906_v9 = vld [vmem:[#allocation5 + $0x430] sm:$0xf0]  ;;  %v5198_v11 = vld [vmem:[#allocation5 + $0x664] sm:$0xf]  ;;  %v4069_v15 = vor.u32 %v5166_v6, %v4066_v7 }
  0xa2   :  { %2632 = vmatpush.bf16.msra.mxu0 %v4101_v51  ;;  %v4194_v12 = vld [vmem:[#allocation5 + $0x670] sm:$0xf0]  ;;  %v5230_v13 = vld [vmem:[#allocation5 + $0x764] sm:$0xf]  ;;  %v3909_v17 = vor.u32 %v5126_v5, %v3906_v9 }
  0xa3   :  { %2645 = vmatpush.bf16.msra.mxu1 %v4229_v53  ;;  %v4322_v14 = vld [vmem:[#allocation5 + $0x770] sm:$0xf0]  ;;  %v5122_v16 = vld [vmem:[#allocation5 + $0x404] sm:$0xf]  ;;  %v4197_v18 = vor.u32 %v5198_v11, %v4194_v12 }
  0xa4   :  { %2658 = vmatpush.bf16.msra.mxu2 %v4357_v59  ;;  %v3890_v19 = vld [vmem:[#allocation5 + $0x410] sm:$0xf0]  ;;  %v5162_v20 = vld [vmem:[#allocation5 + $0x544] sm:$0xf]  ;;  %v4325_v22 = vor.u32 %v5230_v13, %v4322_v14 }
  0xa5   :  { %2621 = vmatpush.bf16.msra.mxu3 %v3941_v52  ;;  %v4050_v21 = vld [vmem:[#allocation5 + $0x550] sm:$0xf0]  ;;  %v5194_v24 = vld [vmem:[#allocation5 + $0x644] sm:$0xf]  ;;  %v3893_v33 = vor.u32 %v5122_v16, %v3890_v19  ;;  %v1639_v52 = vunpack.c.h.b16 %v5596_v56 }
  0xa6   :  { %2633 = vmatpush.bf16.msra.mxu0 %v4085_v2  ;;  %v4178_v25 = vld [vmem:[#allocation5 + $0x650] sm:$0xf0]  ;;  %v5226_v26 = vld [vmem:[#allocation5 + $0x744] sm:$0xf]  ;;  %v4053_v30 = vor.u32 %v5162_v20, %v4050_v21 }
  0xa7   :  { %2646 = vmatpush.bf16.msra.mxu1 %v4213_v4  ;;  %v4306_v27 = vld [vmem:[#allocation5 + $0x750] sm:$0xf0]  ;;  %v5278_v28 = vld [vmem:[#allocation5 + $0x8e4] sm:$0xf]  ;;  %v4181_v34 = vor.u32 %v5194_v24, %v4178_v25  ;;  %v2015_v56 = vpack.c.b16 %v1639_v52, %v1639_v52 }
  0xa8   :  { %2659 = vmatpush.bf16.msra.mxu2 %v4341_v8  ;;  %v4514_v29 = vld [vmem:[#allocation5 + $0x8f0] sm:$0xf0]  ;;  %v5158_v35 = vld [vmem:[#allocation5 + $0x524] sm:$0xf]  ;;  %v4309_v41 = vor.u32 %v5226_v26, %v4306_v27 }
  0xa9   :  { %2622 = vmatpush.bf16.msra.mxu3 %v3925_v3  ;;  %v4034_v39 = vld [vmem:[#allocation5 + $0x530] sm:$0xf0]  ;;  %v4517_v44 = vor.u32 %v5278_v28, %v4514_v29  ;;  %v5190_v45 = vld [vmem:[#allocation5 + $0x624] sm:$0xf] }
  0xaa   :  { %2634 = vmatpush.bf16.msra.mxu0 %v4069_v15  ;;  %v4162_v46 = vld [vmem:[#allocation5 + $0x630] sm:$0xf0]  ;;  %v5222_v48 = vld [vmem:[#allocation5 + $0x724] sm:$0xf]  ;;  %v4037_v53 = vor.u32 %v5158_v35, %v4034_v39 }
  0xab   :  { %2647 = vmatpush.bf16.msra.mxu1 %v4197_v18  ;;  %v4290_v49 = vld [vmem:[#allocation5 + $0x730] sm:$0xf0]  ;;  %v5274_v50 = vld [vmem:[#allocation5 + $0x8c4] sm:$0xf]  ;;  %v4165_v55 = vor.u32 %v5190_v45, %v4162_v46 }
  0xac   :  { %2660 = vmatpush.bf16.msra.mxu2 %v4325_v22  ;;  %v4498_v51 = vld [vmem:[#allocation5 + $0x8d0] sm:$0xf0]  ;;  %v5154_v54 = vld [vmem:[#allocation5 + $0x504] sm:$0xf]  ;;  %v4293_v62 = vor.u32 %v5222_v48, %v4290_v49 }
  0xad   :  { %2623 = vmatpush.bf16.msra.mxu3 %v3909_v17  ;;  %v4018_v57 = vld [vmem:[#allocation5 + $0x510] sm:$0xf0]  ;;  %v5186_v59 = vld [vmem:[#allocation5 + $0x604] sm:$0xf]  ;;  %v4501_v63 = vor.u32 %v5274_v50, %v4498_v51  ;;  %v2401_v17 = vand.u32 %v5602_v23, %v2015_v56 }
  0xae   :  { %2635 = vmatpush.bf16.msra.mxu0 %v4053_v30  ;;  %v4146_v60 = vld [vmem:[#allocation5 + $0x610] sm:$0xf0]  ;;  %v5218_v0 = vld [vmem:[#allocation5 + $0x704] sm:$0xf]  ;;  %v4021_v6 = vor.u32 %v5154_v54, %v4018_v57 }
  0xaf   :  { %2648 = vmatpush.bf16.msra.mxu1 %v4181_v34  ;;  %v5310_v1 = vld [vmem:[#allocation5 + $0x9e4] sm:$0xf]  ;;  %v4642_v2 = vld [vmem:[#allocation5 + $0x9f0] sm:$0xf0]  ;;  %v4149_v9 = vor.u32 %v5186_v59, %v4146_v60 }
  0xb0   :  { %2661 = vmatpush.bf16.msra.mxu2 %v4309_v41  ;;  %v4274_v3 = vld [vmem:[#allocation5 + $0x710] sm:$0xf0]  ;;  %v5270_v4 = vld [vmem:[#allocation5 + $0x8a4] sm:$0xf]  ;;  %v4645_v11 = vor.u32 %v5310_v1, %v4642_v2 }
  0xb1   :  { %2624 = vmatpush.bf16.msra.mxu3 %v3893_v33  ;;  %v4482_v5 = vld [vmem:[#allocation5 + $0x8b0] sm:$0xf0]  ;;  %v5342_v7 = vld [vmem:[#allocation5 + $0xae4] sm:$0xf]  ;;  %v4277_v12 = vor.u32 %v5218_v0, %v4274_v3 }
  0xb2   :  { %2636 = vmatpush.bf16.msra.mxu0 %v4037_v53  ;;  %v4770_v8 = vld [vmem:[#allocation5 + $0xaf0] sm:$0xf0]  ;;  %v4485_v13 = vor.u32 %v5270_v4, %v4482_v5  ;;  %v5306_v14 = vld [vmem:[#allocation5 + $0x9c4] sm:$0xf] }
  0xb3   :  { %2649 = vmatpush.bf16.msra.mxu1 %v4165_v55  ;;  %v4626_v15 = vld [vmem:[#allocation5 + $0x9d0] sm:$0xf0]  ;;  %v4773_v16 = vor.u32 %v5342_v7, %v4770_v8  ;;  %v5266_v18 = vld [vmem:[#allocation5 + $0x884] sm:$0xf] }
  0xb4   :  { %2625 = vmatmul.bf16.vlgmr.msra.gmra.mxu3 %v5610_v58  ;;  %2662 = vmatpush.bf16.msra.mxu2 %v4293_v62  ;;  %v4466_v19 = vld [vmem:[#allocation5 + $0x890] sm:$0xf0]  ;;  %v5338_v20 = vld [vmem:[#allocation5 + $0xac4] sm:$0xf]  ;;  %v4629_v25 = vor.u32 %v5306_v14, %v4626_v15 }
  0xb5   :  { %2669 = vmatpush.bf16.msrb.mxu3 %v4517_v44  ;;  %v4754_v21 = vld [vmem:[#allocation5 + $0xad0] sm:$0xf0]  ;;  %v5362_v22 = vld [vmem:[#allocation5 + $0xb84] sm:$0xf]  ;;  %v4469_v26 = vor.u32 %v5266_v18, %v4466_v19 }
  0xb6   :  { %2637 = vmatpush.bf16.msra.mxu0 %v4021_v6  ;;  %v4850_v24 = vld [vmem:[#allocation5 + $0xb90] sm:$0xf0]  ;;  %v5302_v27 = vld [vmem:[#allocation5 + $0x9a4] sm:$0xf]  ;;  %v4757_v29 = vor.u32 %v5338_v20, %v4754_v21  ;;  %v3496_v21 = vld [vmem:[#allocation5 + $0xe8] sm:$0xf] }
  0xb7   :  { %2650 = vmatpush.bf16.msra.mxu1 %v4149_v9  ;;  %v4610_v28 = vld [vmem:[#allocation5 + $0x9b0] sm:$0xf0]  ;;  %v4853_v30 = vor.u32 %v5362_v22, %v4850_v24  ;;  %v5262_v33 = vld [vmem:[#allocation5 + $0x864] sm:$0xf]  ;;  %v5025_v24 = vld [vmem:[#allocation5 + $0xf4] sm:$0xf0] }
  0xb8   :  { %2663 = vmatpush.bf16.msra.mxu2 %v4277_v12  ;;  %v4450_v34 = vld [vmem:[#allocation5 + $0x870] sm:$0xf0]  ;;  %v5334_v35 = vld [vmem:[#allocation5 + $0xaa4] sm:$0xf]  ;;  %v4613_v45 = vor.u32 %v5302_v27, %v4610_v28 }
  0xb9   :  { %2670 = vmatpush.bf16.msrb.mxu3 %v4501_v63  ;;  %v4738_v39 = vld [vmem:[#allocation5 + $0xab0] sm:$0xf0]  ;;  %v5358_v41 = vld [vmem:[#allocation5 + $0xb64] sm:$0xf]  ;;  %2638 = vmatmul.bf16.vlgmr.msra.gmra.mxu0 %v5613_v61  ;;  %v4453_v46 = vor.u32 %v5262_v33, %v4450_v34 }
  0xba   :  { %2682 = vmatpush.bf16.msrb.mxu0 %v4645_v11  ;;  %v4834_v44 = vld [vmem:[#allocation5 + $0xb70] sm:$0xf0]  ;;  %2651 = vmatmul.bf16.vlgmr.msra.gmra.mxu1 %v5605_v37  ;;  %v5298_v48 = vld [vmem:[#allocation5 + $0x984] sm:$0xf]  ;;  %v4741_v50 = vor.u32 %v5334_v35, %v4738_v39  ;;  %v3497_v35 = vor.u32 %v5025_v24, %v3496_v21 }
  0xbb   :  { %2695 = vmatpush.bf16.msrb.mxu1 %v4773_v16  ;;  %2664 = vmatmul.bf16.vlgmr.msra.gmra.mxu2 %v5607_v42  ;;  %v4594_v49 = vld [vmem:[#allocation5 + $0x990] sm:$0xf0]  ;;  %v4837_v51 = vor.u32 %v5358_v41, %v4834_v44  ;;  %v5258_v52 = vld [vmem:[#allocation5 + $0x844] sm:$0xf]  ;;  %v3480_v44 = vld [vmem:[#allocation5 + $0xc8] sm:$0xf] }
  0xbc   :  { %2710 = vmatpush.bf16.msrb.mxu2 %v2401_v17  ;;  %v4434_v53 = vld [vmem:[#allocation5 + $0x850] sm:$0xf0]  ;;  %v5330_v54 = vld [vmem:[#allocation5 + $0xa84] sm:$0xf]  ;;  %v4597_v60 = vor.u32 %v5298_v48, %v4594_v49  ;;  %v5021_v48 = vld [vmem:[#allocation5 + $0xd4] sm:$0xf0] }
  0xbd   :  { %2671 = vmatpush.bf16.msrb.mxu3 %v4485_v13  ;;  %v4722_v55 = vld [vmem:[#allocation5 + $0xa90] sm:$0xf0]  ;;  %v5354_v57 = vld [vmem:[#allocation5 + $0xb44] sm:$0xf]  ;;  %v4437_v62 = vor.u32 %v5258_v52, %v4434_v53  ;;  %v3608_v49 = vld [vmem:[#allocation5 + $0x1c8] sm:$0xf] }
  0xbe   :  { %2683 = vmatpush.bf16.msrb.mxu0 %v4629_v25  ;;  %v4818_v59 = vld [vmem:[#allocation5 + $0xb50] sm:$0xf0]  ;;  %v5294_v63 = vld [vmem:[#allocation5 + $0x964] sm:$0xf]  ;;  %v4725_v1 = vor.u32 %v5330_v54, %v4722_v55  ;;  %v3624_v25 = vld [vmem:[#allocation5 + $0x1e8] sm:$0xf] }
  0xbf   :  { %2696 = vmatpush.bf16.msrb.mxu1 %v4757_v29  ;;  %v4578_v0 = vld [vmem:[#allocation5 + $0x970] sm:$0xf0]  ;;  %v4821_v2 = vor.u32 %v5354_v57, %v4818_v59  ;;  %v5254_v3 = vld [vmem:[#allocation5 + $0x824] sm:$0xf]  ;;  %v3752_v54 = vld [vmem:[#allocation5 + $0x2e8] sm:$0xf]  ;;  %v3481_v59 = vor.u32 %v5021_v48, %v3480_v44 }
  0xc0   :  { %2711 = vmatpush.bf16.msrb.mxu2 %v4853_v30  ;;  %v4418_v4 = vld [vmem:[#allocation5 + $0x830] sm:$0xf0]  ;;  %v5326_v5 = vld [vmem:[#allocation5 + $0xa64] sm:$0xf]  ;;  %v4581_v8 = vor.u32 %v5294_v63, %v4578_v0  ;;  %v5089_v55 = vld [vmem:[#allocation5 + $0x2f4] sm:$0xf0] }
  0xc1   :  { %2672 = vmatpush.bf16.msrb.mxu3 %v4469_v26  ;;  %v4706_v56 = vld [vmem:[#allocation5 + $0xa70] sm:$0xf0]  ;;  %v5350_v6 = vld [vmem:[#allocation5 + $0xb24] sm:$0xf]  ;;  %v4421_v9 = vor.u32 %v5254_v3, %v4418_v4  ;;  %v5057_v26 = vld [vmem:[#allocation5 + $0x1f4] sm:$0xf0] }
  0xc2   :  { %2684 = vmatpush.bf16.msrb.mxu0 %v4613_v45  ;;  %v4802_v7 = vld [vmem:[#allocation5 + $0xb30] sm:$0xf0]  ;;  %v5250_v11 = vld [vmem:[#allocation5 + $0x804] sm:$0xf]  ;;  %v4709_v14 = vor.u32 %v5326_v5, %v4706_v56  ;;  %v3625_v39 = vor.u32 %v5057_v26, %v3624_v25  ;;  %v5640_v45 = vld [vmem:[#allocation7] sm:$0xf]  ;;  %v3753_v5 = vor.u32 %v5089_v55, %v3752_v54 }
  0xc3   :  { %2697 = vmatpush.bf16.msrb.mxu1 %v4741_v50  ;;  %v5290_v12 = vld [vmem:[#allocation5 + $0x944] sm:$0xf]  ;;  %v4562_v13 = vld [vmem:[#allocation5 + $0x950] sm:$0xf0]  ;;  %v4805_v15 = vor.u32 %v5350_v6, %v4802_v7  ;;  %v5053_v50 = vld [vmem:[#allocation5 + $0x1d4] sm:$0xf0] }
  0xc4   :  { %2712 = vmatpush.bf16.msrb.mxu2 %v4837_v51  ;;  %v4402_v16 = vld [vmem:[#allocation5 + $0x810] sm:$0xf0]  ;;  %v5322_v17 = vld [vmem:[#allocation5 + $0xa44] sm:$0xf]  ;;  %v4565_v22 = vor.u32 %v5290_v12, %v4562_v13  ;;  %v512_v57 = vperm.slane %v5640_v45, 0 }
  0xc5   :  { %2673 = vmatpush.bf16.msrb.mxu3 %v4453_v46  ;;  %v4690_v18 = vld [vmem:[#allocation5 + $0xa50] sm:$0xf0]  ;;  %v5346_v19 = vld [vmem:[#allocation5 + $0xb04] sm:$0xf]  ;;  %v4405_v27 = vor.u32 %v5250_v11, %v4402_v16  ;;  %v3464_v0 = vld [vmem:[#allocation5 + $0xa8] sm:$0xf] }
  0xc6   :  { %2685 = vmatpush.bf16.msrb.mxu0 %v4597_v60  ;;  %v4786_v20 = vld [vmem:[#allocation5 + $0xb10] sm:$0xf0]  ;;  %v5286_v28 = vld [vmem:[#allocation5 + $0x924] sm:$0xf]  ;;  %v4693_v30 = vor.u32 %v5322_v17, %v4690_v18  ;;  %v3609_v60 = vor.u32 %v5053_v50, %v3608_v49  ;;  %v3592_v3 = vld [vmem:[#allocation5 + $0x1a8] sm:$0xf] }
  0xc7   :  { %2698 = vmatpush.bf16.msrb.mxu1 %v4725_v1  ;;  %v4546_v29 = vld [vmem:[#allocation5 + $0x930] sm:$0xf0]  ;;  %v4789_v33 = vor.u32 %v5346_v19, %v4786_v20  ;;  %v5318_v34 = vld [vmem:[#allocation5 + $0xa24] sm:$0xf]  ;;  %v5049_v4 = vld [vmem:[#allocation5 + $0x1b4] sm:$0xf0] }
  0xc8   :  { %2713 = vmatpush.bf16.msrb.mxu2 %v4821_v2  ;;  %v4674_v41 = vld [vmem:[#allocation5 + $0xa30] sm:$0xf0]  ;;  %v4549_v46 = vor.u32 %v5286_v28, %v4546_v29  ;;  %v5282_v51 = vld [vmem:[#allocation5 + $0x904] sm:$0xf]  ;;  %v5017_v2 = vld [vmem:[#allocation5 + $0xb4] sm:$0xf0] }
  0xc9   :  { %2674 = vmatpush.bf16.msrb.mxu3 %v4437_v62  ;;  %v4530_v52 = vld [vmem:[#allocation5 + $0x910] sm:$0xf0]  ;;  %v4677_v53 = vor.u32 %v5318_v34, %v4674_v41  ;;  %v5314_v62 = vld [vmem:[#allocation5 + $0xa04] sm:$0xf]  ;;  %v3880_v56 = vld [vmem:[#allocation5 + $0x3e8] sm:$0xf]  ;;  %v2418_v7 = vpop.f32.mrf.mxu0 }
  0xca   :  { %2686 = vmatpush.bf16.msrb.mxu0 %v4581_v8  ;;  %v4658_v63 = vld [vmem:[#allocation5 + $0xa10] sm:$0xf0]  ;;  %v4533_v1 = vor.u32 %v5282_v51, %v4530_v52  ;;  %v5121_v6 = vld [vmem:[#allocation5 + $0x3f4] sm:$0xf0]  ;;  %v3736_v11 = vld [vmem:[#allocation5 + $0x2c8] sm:$0xf] }
  0xcb   :  { %2699 = vmatpush.bf16.msrb.mxu1 %v4709_v14  ;;  %v4661_v8 = vor.u32 %v5314_v62, %v4658_v63  ;;  %v5085_v12 = vld [vmem:[#allocation5 + $0x2d4] sm:$0xf0]  ;;  %v3465_v14 = vor.u32 %v5017_v2, %v3464_v0  ;;  %v3448_v16 = vld [vmem:[#allocation5 + $0x88] sm:$0xf]  ;;  %v3881_v17 = vor.u32 %v5121_v6, %v3880_v56 }
  0xcc   :  { %2714 = vmatpush.bf16.msrb.mxu2 %v4805_v15  ;;  %v2431_v13 = vpop.f32.mrf.mxu1  ;;  %v3593_v15 = vor.u32 %v5049_v4, %v3592_v3  ;;  %v5013_v18 = vld [vmem:[#allocation5 + $0x94] sm:$0xf0]  ;;  %v3576_v19 = vld [vmem:[#allocation5 + $0x188] sm:$0xf]  ;;  %v3737_v25 = vor.u32 %v5085_v12, %v3736_v11 }
  0xcd   :  { %2675 = vmatpush.bf16.msrb.mxu3 %v4421_v9  ;;  %v2419_v9 = vadd.f32 %v2418_v7, %v512_v57  ;;  %v5045_v20 = vld [vmem:[#allocation5 + $0x194] sm:$0xf0]  ;;  %v3864_v26 = vld [vmem:[#allocation5 + $0x3c8] sm:$0xf] }
  0xce   :  { %2687 = vmatpush.bf16.msrb.mxu0 %v4565_v22  ;;  %v2444_v22 = vpop.f32.mrf.mxu2  ;;  %v3720_v29 = vld [vmem:[#allocation5 + $0x2a8] sm:$0xf]  ;;  %v3577_v34 = vor.u32 %v5045_v20, %v3576_v19  ;;  %v5009_v41 = vld [vmem:[#allocation5 + $0x74] sm:$0xf0] }
  0xcf   :  { %2700 = vmatpush.bf16.msrb.mxu1 %v4693_v30  ;;  %v2432_v21 = vadd.f32 %v2431_v13, %v2419_v9  ;;  %v5081_v30 = vld [vmem:[#allocation5 + $0x2b4] sm:$0xf0]  ;;  %v3560_v44 = vld [vmem:[#allocation5 + $0x168] sm:$0xf] }
  0xd0   :  { %2715 = vmatpush.bf16.msrb.mxu2 %v4789_v33  ;;  %v2457_v24 = vpop.f32.mrf.mxu3  ;;  %v3449_v33 = vor.u32 %v5013_v18, %v3448_v16  ;;  %v3721_v49 = vor.u32 %v5081_v30, %v3720_v29  ;;  %v3848_v50 = vld [vmem:[#allocation5 + $0x3a8] sm:$0xf]  ;;  %v5113_v51 = vld [vmem:[#allocation5 + $0x3b4] sm:$0xf0] }
  0xd1   :  { %2676 = vmatpush.bf16.msrb.mxu3 %v4405_v27  ;;  %v5117_v27 = vld [vmem:[#allocation5 + $0x3d4] sm:$0xf0]  ;;  %v2445_v28 = vadd.f32 %v2444_v22, %v2432_v21  ;;  %v2420_v52 = vpop.f32.mrf.mxu0  ;;  %v3849_v62 = vor.u32 %v5113_v51, %v3848_v50  ;;  %v3544_v0 = vld [vmem:[#allocation5 + $0x148] sm:$0xf] }
  0xd2   :  { %2688 = vmatpush.bf16.msrb.mxu0 %v4549_v46  ;;  %v5041_v46 = vld [vmem:[#allocation5 + $0x174] sm:$0xf0]  ;;  %v3688_v6 = vld [vmem:[#allocation5 + $0x268] sm:$0xf] }
  0xd3   :  { %4863 = vmatmul.msk.bf16.vlgmr.msrb.gmra.mxu2 %vm2390_vm1, %v5617_v10  ;;  %2701 = vmatpush.bf16.msrb.mxu1 %v4677_v53  ;;  %v2458_v48 = vadd.f32 %v2457_v24, %v2445_v28  ;;  %v3704_v53 = vld [vmem:[#allocation5 + $0x288] sm:$0xf]  ;;  %v5077_v54 = vld [vmem:[#allocation5 + $0x294] sm:$0xf0] }
  0xd4   :  { %2721 = vmatpush.bf16.msra.mxu2 %v3497_v35  ;;  %2677 = vmatmul.bf16.vlgmr.msrb.gmra.mxu3 %v5621_v31  ;;  %v3432_v35 = vld [vmem:[#allocation5 + $0x68] sm:$0xf]  ;;  %v2433_v55 = vpop.f32.mrf.mxu1  ;;  %v5005_v63 = vld [vmem:[#allocation5 + $0x54] sm:$0xf0]  ;;  %v3705_v4 = vor.u32 %v5077_v54, %v3704_v53 }
  0xd5   :  { %2734 = vmatpush.bf16.msra.mxu3 %v3625_v39  ;;  %v3865_v39 = vor.u32 %v5117_v27, %v3864_v26  ;;  %v3433_v57 = vor.u32 %v5009_v41, %v3432_v35  ;;  %v5109_v56 = vld [vmem:[#allocation5 + $0x394] sm:$0xf0]  ;;  %v3400_v11 = vld [vmem:[#allocation5 + $0x28] sm:$0xf] }
  0xd6   :  { %2689 = vmatpush.bf16.msrb.mxu0 %v4533_v1  ;;  %v5037_v1 = vld [vmem:[#allocation5 + $0x154] sm:$0xf0]  ;;  %v2446_v2 = vpop.f32.mrf.mxu2  ;;  %v3672_v19 = vld [vmem:[#allocation5 + $0x248] sm:$0xf] }
  0xd7   :  { %2702 = vmatpush.bf16.msrb.mxu1 %v4661_v8  ;;  %v5073_v7 = vld [vmem:[#allocation5 + $0x274] sm:$0xf0]  ;;  %v3545_v9 = vor.u32 %v5037_v1, %v3544_v0  ;;  %v3512_v27 = vld [vmem:[#allocation5 + $0x108] sm:$0xf] }
  0xd8   :  { %2722 = vmatpush.bf16.msra.mxu2 %v3481_v59  ;;  %v3561_v59 = vor.u32 %v5041_v46, %v3560_v44  ;;  %v2459_v3 = vpop.f32.mrf.mxu3  ;;  %v5001_v13 = vld [vmem:[#allocation5 + $0x34] sm:$0xf0]  ;;  %v3689_v16 = vor.u32 %v5073_v7, %v3688_v6  ;;  %v4008_v41 = vld [vmem:[#allocation5 + $0x4e8] sm:$0xf] }
  0xd9   :  { %2735 = vmatpush.bf16.msra.mxu3 %v3609_v60  ;;  %2690 = vmatmul.bf16.vlgmr.msrb.gmra.mxu0 %v5625_v36  ;;  %v3416_v60 = vld [vmem:[#allocation5 + $0x48] sm:$0xf]  ;;  %v5105_v18 = vld [vmem:[#allocation5 + $0x374] sm:$0xf0]  ;;  %v3401_v21 = vor.u32 %v5001_v13, %v3400_v11 }
  0xda   :  { %2747 = vmatpush.bf16.msra.mxu0 %v3753_v5  ;;  %2703 = vmatmul.bf16.vlgmr.msrb.gmra.mxu1 %v5623_v32  ;;  %v3832_v5 = vld [vmem:[#allocation5 + $0x388] sm:$0xf]  ;;  %v3417_v8 = vor.u32 %v5005_v63, %v3416_v60  ;;  %v5069_v20 = vld [vmem:[#allocation5 + $0x254] sm:$0xf0] }
  0xdb   :  { %2760 = vmatpush.bf16.msra.mxu1 %v3881_v17  ;;  %v3833_v12 = vor.u32 %v5109_v56, %v3832_v5  ;;  %v3816_v17 = vld [vmem:[#allocation5 + $0x368] sm:$0xf]  ;;  %v4997_v26 = vld [vmem:[#allocation5 + $0x14] sm:$0xf0] }
  0xdc   :  { %2723 = vmatpush.bf16.msra.mxu2 %v3465_v14  ;;  %v3528_v14 = vld [vmem:[#allocation5 + $0x128] sm:$0xf]  ;;  %v3817_v28 = vor.u32 %v5105_v18, %v3816_v17  ;;  %v5029_v30 = vld [vmem:[#allocation5 + $0x114] sm:$0xf0] }
  0xdd   :  { %2736 = vmatpush.bf16.msra.mxu3 %v3593_v15  ;;  %v5033_v15 = vld [vmem:[#allocation5 + $0x134] sm:$0xf0]  ;;  %v4136_v46 = vld [vmem:[#allocation5 + $0x5e8] sm:$0xf] }
  0xde   :  { %2748 = vmatpush.bf16.msra.mxu0 %v3737_v25  ;;  %v3529_v22 = vor.u32 %v5033_v15, %v3528_v14  ;;  %v2470_v24 = vpop.f32.mrf.mxu0  ;;  %v3384_v25 = vld [vmem:[#allocation5 + $0x8] sm:$0xf]  ;;  %v2483_v35 = vpop.f32.mrf.mxu1  ;;  %v5153_v44 = vld [vmem:[#allocation5 + $0x4f4] sm:$0xf0] }
  0xdf   :  { %2761 = vmatpush.bf16.msra.mxu1 %v3865_v39  ;;  %v2471_v29 = vadd.f32 %v2470_v24, %v2458_v48  ;;  %v3673_v39 = vor.u32 %v5069_v20, %v3672_v19  ;;  %v5185_v51 = vld [vmem:[#allocation5 + $0x5f4] sm:$0xf0]  ;;  %v3656_v52 = vld [vmem:[#allocation5 + $0x228] sm:$0xf]  ;;  %v3385_v55 = vor.u32 %v4997_v26, %v3384_v25 }
  0xe0   :  { %2724 = vmatpush.bf16.msra.mxu2 %v3449_v33  ;;  %v3800_v33 = vld [vmem:[#allocation5 + $0x348] sm:$0xf]  ;;  %v5065_v53 = vld [vmem:[#allocation5 + $0x234] sm:$0xf0]  ;;  %v2509_v54 = vpop.f32.mrf.mxu3  ;;  %v4137_v0 = vor.u32 %v5185_v51, %v4136_v46 }
  0xe1   :  { %2737 = vmatpush.bf16.msra.mxu3 %v3577_v34  ;;  %v5101_v34 = vld [vmem:[#allocation5 + $0x354] sm:$0xf0]  ;;  %v2484_v50 = vadd.f32 %v2483_v35, %v2471_v29  ;;  %v3657_v1 = vor.u32 %v5065_v53, %v3656_v52  ;;  %v3992_v2 = vld [vmem:[#allocation5 + $0x4c8] sm:$0xf] }
  0xe2   :  { %2749 = vmatpush.bf16.msra.mxu0 %v3721_v49  ;;  %v2496_v49 = vpop.f32.mrf.mxu2  ;;  %v3801_v48 = vor.u32 %v5101_v34, %v3800_v33  ;;  %v5097_v63 = vld [vmem:[#allocation5 + $0x334] sm:$0xf0]  ;;  %v3640_v6 = vld [vmem:[#allocation5 + $0x208] sm:$0xf] }
  0xe3   :  { %2762 = vmatpush.bf16.msra.mxu1 %v3849_v62  ;;  %v2497_v60 = vadd.f32 %v2496_v49, %v2484_v50  ;;  %v3784_v62 = vld [vmem:[#allocation5 + $0x328] sm:$0xf]  ;;  %v5149_v3 = vld [vmem:[#allocation5 + $0x4d4] sm:$0xf0] }
  0xe4   :  { %2725 = vmatpush.bf16.msra.mxu2 %v3433_v57  ;;  %v3513_v57 = vor.u32 %v5029_v30, %v3512_v27  ;;  %v5181_v56 = vld [vmem:[#allocation5 + $0x5d4] sm:$0xf0]  ;;  %v3993_v13 = vor.u32 %v5149_v3, %v3992_v2  ;;  %v3768_v14 = vld [vmem:[#allocation5 + $0x308] sm:$0xf] }
  0xe5   :  { %2738 = vmatpush.bf16.msra.mxu3 %v3561_v59  ;;  %v4009_v59 = vor.u32 %v5153_v44, %v4008_v41  ;;  %v5648_v5 = vadd.f32 %v2509_v54, %v2497_v60  ;;  %v5061_v7 = vld [vmem:[#allocation5 + $0x214] sm:$0xf0]  ;;  %v3976_v19 = vld [vmem:[#allocation5 + $0x4a8] sm:$0xf] }
  0xe6   :  { %2750 = vmatpush.bf16.msra.mxu0 %v3705_v4  ;;  %v4120_v4 = vld [vmem:[#allocation5 + $0x5c8] sm:$0xf]  ;;  %v2472_v11 = vpop.f32.mrf.mxu0  ;;  %v5093_v15 = vld [vmem:[#allocation5 + $0x314] sm:$0xf0]  ;;  %v3641_v18 = vor.u32 %v5061_v7, %v3640_v6 }
  0xe7   :  { %2763 = vmatpush.bf16.msra.mxu1 %v3833_v12  ;;  %v3785_v12 = vor.u32 %v5097_v63, %v3784_v62  ;;  %v4121_v17 = vor.u32 %v5181_v56, %v4120_v4  ;;  %v5145_v20 = vld [vmem:[#allocation5 + $0x4b4] sm:$0xf0]  ;;  %v4392_v26 = vld [vmem:[#allocation5 + $0x7e8] sm:$0xf]  ;;  %v3769_v33 = vor.u32 %v5093_v15, %v3768_v14 }
  0xe8   :  { %2726 = vmatpush.bf16.msra.mxu2 %v3417_v8  ;;  %v4264_v8 = vld [vmem:[#allocation5 + $0x6e8] sm:$0xf]  ;;  %v5177_v24 = vld [vmem:[#allocation5 + $0x5b4] sm:$0xf0]  ;;  %v3977_v34 = vor.u32 %v5145_v20, %v3976_v19 }
  0xe9   :  { %2739 = vmatpush.bf16.msra.mxu3 %v3545_v9  ;;  %v5217_v9 = vld [vmem:[#allocation5 + $0x6f4] sm:$0xf0]  ;;  %v4248_v29 = vld [vmem:[#allocation5 + $0x6c8] sm:$0xf] }
  0xea   :  { %2751 = vmatpush.bf16.msra.mxu0 %v3689_v16  ;;  %v2485_v16 = vpop.f32.mrf.mxu1  ;;  %v4265_v25 = vor.u32 %v5217_v9, %v4264_v8  ;;  %v5249_v27 = vld [vmem:[#allocation5 + $0x7f4] sm:$0xf0]  ;;  %v3960_v41 = vld [vmem:[#allocation5 + $0x488] sm:$0xf] }
  0xeb   :  { %2764 = vmatpush.bf16.msra.mxu1 %v3817_v28  ;;  %v2511_v28 = vpop.f32.mrf.mxu3  ;;  %v5213_v30 = vld [vmem:[#allocation5 + $0x6d4] sm:$0xf0]  ;;  %v4088_v46 = vld [vmem:[#allocation5 + $0x588] sm:$0xf] }
  0xec   :  { %2727 = vmatpush.bf16.msra.mxu2 %v3401_v21  ;;  %v4104_v21 = vld [vmem:[#allocation5 + $0x5a8] sm:$0xf]  ;;  %v5141_v44 = vld [vmem:[#allocation5 + $0x494] sm:$0xf0]  ;;  %v4249_v50 = vor.u32 %v5213_v30, %v4248_v29 }
  0xed   :  { %2740 = vmatpush.bf16.msra.mxu3 %v3529_v22  ;;  %v2498_v22 = vpop.f32.mrf.mxu2  ;;  %v4105_v35 = vor.u32 %v5177_v24, %v4104_v21  ;;  %v5173_v49 = vld [vmem:[#allocation5 + $0x594] sm:$0xf0]  ;;  %v4376_v51 = vld [vmem:[#allocation5 + $0x7c8] sm:$0xf] }
  0xee   :  { %2752 = vmatpush.bf16.msra.mxu0 %v3673_v39  ;;  %v4393_v39 = vor.u32 %v5249_v27, %v4392_v26  ;;  %v5245_v52 = vld [vmem:[#allocation5 + $0x7d4] sm:$0xf0]  ;;  %v4232_v53 = vld [vmem:[#allocation5 + $0x6a8] sm:$0xf] }
  0xef   :  { %2765 = vmatpush.bf16.msra.mxu1 %v3801_v48  ;;  %v5209_v54 = vld [vmem:[#allocation5 + $0x6b4] sm:$0xf0]  ;;  %v4377_v48 = vor.u32 %v5245_v52, %v4376_v51  ;;  %v4072_v62 = vld [vmem:[#allocation5 + $0x568] sm:$0xf] }
  0xf0   :  { %2728 = vmatpush.bf16.msra.mxu2 %v3385_v55  ;;  %v3961_v55 = vor.u32 %v5141_v44, %v3960_v41  ;;  %v5137_v60 = vld [vmem:[#allocation5 + $0x474] sm:$0xf0]  ;;  %v4216_v3 = vld [vmem:[#allocation5 + $0x688] sm:$0xf] }
  0xf1   :  { %2741 = vmatpush.bf16.msra.mxu3 %v3513_v57  ;;  %v4089_v57 = vor.u32 %v5173_v49, %v4088_v46  ;;  %v5169_v63 = vld [vmem:[#allocation5 + $0x574] sm:$0xf0]  ;;  %v3928_v8 = vld [vmem:[#allocation5 + $0x448] sm:$0xf] }
  0xf2   :  { %2753 = vmatpush.bf16.msra.mxu0 %v3657_v1  ;;  %v4360_v1 = vld [vmem:[#allocation5 + $0x7a8] sm:$0xf]  ;;  %v5241_v2 = vld [vmem:[#allocation5 + $0x7b4] sm:$0xf0]  ;;  %v4073_v6 = vor.u32 %v5169_v63, %v4072_v62 }
  0xf3   :  { %2729 = vmatmul.bf16.vlgmr.msra.gmra.mxu2 %v5590_v43  ;;  %2766 = vmatpush.bf16.msra.mxu1 %v3785_v12  ;;  %v5205_v4 = vld [vmem:[#allocation5 + $0x694] sm:$0xf0]  ;;  %v4361_v7 = vor.u32 %v5241_v2, %v4360_v1  ;;  %v4056_v11 = vld [vmem:[#allocation5 + $0x548] sm:$0xf] }
  0xf4   :  { %2773 = vmatpush.bf16.msrb.mxu2 %v4009_v59  ;;  %2742 = vmatmul.bf16.vlgmr.msra.gmra.mxu3 %v5594_v47  ;;  %v3944_v59 = vld [vmem:[#allocation5 + $0x468] sm:$0xf]  ;;  %v5133_v9 = vld [vmem:[#allocation5 + $0x454] sm:$0xf0] }
  0xf5   :  { %2786 = vmatpush.bf16.msrb.mxu3 %v4137_v0  ;;  %v4233_v0 = vor.u32 %v5209_v54, %v4232_v53  ;;  %v3945_v56 = vor.u32 %v5137_v60, %v3944_v59  ;;  %v5165_v12 = vld [vmem:[#allocation5 + $0x554] sm:$0xf0]  ;;  %v4344_v14 = vld [vmem:[#allocation5 + $0x788] sm:$0xf] }
  0xf6   :  { %2754 = vmatpush.bf16.msra.mxu0 %v3641_v18  ;;  %v5237_v15 = vld [vmem:[#allocation5 + $0x794] sm:$0xf0]  ;;  %v4200_v16 = vld [vmem:[#allocation5 + $0x668] sm:$0xf]  ;;  %v3929_v18 = vor.u32 %v5133_v9, %v3928_v8  ;;  %v2522_v19 = vpop.f32.mrf.mxu0  ;;  %v4057_v20 = vor.u32 %v5165_v12, %v4056_v11 }
  0xf7   :  { %2767 = vmatpush.bf16.msra.mxu1 %v3769_v33  ;;  %v4345_v21 = vor.u32 %v5237_v15, %v4344_v14  ;;  %v3912_v22 = vld [vmem:[#allocation5 + $0x428] sm:$0xf]  ;;  %v5129_v24 = vld [vmem:[#allocation5 + $0x434] sm:$0xf0]  ;;  %v2523_v27 = vadd.f32 %v2522_v19, %v5648_v5  ;;  %v2535_v28 = vpop.f32.mrf.mxu1 }
  0xf8   :  { %2774 = vmatpush.bf16.msrb.mxu2 %v3993_v13  ;;  %v4217_v13 = vor.u32 %v5205_v4, %v4216_v3  ;;  %v5161_v29 = vld [vmem:[#allocation5 + $0x534] sm:$0xf0]  ;;  %v4328_v33 = vld [vmem:[#allocation5 + $0x768] sm:$0xf]  ;;  %v3913_v44 = vor.u32 %v5129_v24, %v3912_v22 }
  0xf9   :  { %2787 = vmatpush.bf16.msrb.mxu3 %v4121_v17  ;;  %2755 = vmatmul.bf16.vlgmr.msra.gmra.mxu0 %v5586_v38  ;;  %v5201_v17 = vld [vmem:[#allocation5 + $0x674] sm:$0xf0]  ;;  %v2561_v26 = vpop.f32.mrf.mxu3  ;;  %v2536_v41 = vadd.f32 %v2535_v28, %v2523_v27  ;;  %v3896_v46 = vld [vmem:[#allocation5 + $0x408] sm:$0xf] }
  0xfa   :  { %2799 = vmatpush.bf16.msrb.mxu0 %v4265_v25  ;;  %2768 = vmatmul.bf16.vlgmr.msra.gmra.mxu1 %v5588_v40  ;;  %v4040_v25 = vld [vmem:[#allocation5 + $0x528] sm:$0xf]  ;;  %v4201_v30 = vor.u32 %v5201_v17, %v4200_v16  ;;  %v5125_v51 = vld [vmem:[#allocation5 + $0x414] sm:$0xf0] }
  0xfb   :  { %2812 = vmatpush.bf16.msrb.mxu1 %v4393_v39  ;;  %v5197_v39 = vld [vmem:[#allocation5 + $0x654] sm:$0xf0]  ;;  %v4041_v49 = vor.u32 %v5161_v29, %v4040_v25  ;;  %v4024_v52 = vld [vmem:[#allocation5 + $0x508] sm:$0xf] }
  0xfc   :  { %2775 = vmatpush.bf16.msrb.mxu2 %v3977_v34  ;;  %v5233_v34 = vld [vmem:[#allocation5 + $0x774] sm:$0xf0]  ;;  %v4312_v54 = vld [vmem:[#allocation5 + $0x748] sm:$0xf] }
  0xfd   :  { %2788 = vmatpush.bf16.msrb.mxu3 %v4105_v35  ;;  %v4184_v35 = vld [vmem:[#allocation5 + $0x648] sm:$0xf]  ;;  %v5157_v53 = vld [vmem:[#allocation5 + $0x514] sm:$0xf0] }
  0xfe   :  { %2800 = vmatpush.bf16.msrb.mxu0 %v4249_v50  ;;  %v4329_v50 = vor.u32 %v5233_v34, %v4328_v33  ;;  %v4185_v5 = vor.u32 %v5197_v39, %v4184_v35  ;;  %v5281_v59 = vld [vmem:[#allocation5 + $0x8f4] sm:$0xf0]  ;;  %v4648_v60 = vld [vmem:[#allocation5 + $0x9e8] sm:$0xf]  ;;  %v4025_v4 = vor.u32 %v5157_v53, %v4024_v52 }
  0xff   :  { %2813 = vmatpush.bf16.msrb.mxu1 %v4377_v48  ;;  %v2548_v48 = vpop.f32.mrf.mxu2  ;;  %v5313_v62 = vld [vmem:[#allocation5 + $0x9f4] sm:$0xf0]  ;;  %v4168_v1 = vld [vmem:[#allocation5 + $0x628] sm:$0xf]  ;;  %v2537_v15 = vpop.f32.mrf.mxu1 }
 0x100   :  { %2776 = vmatpush.bf16.msrb.mxu2 %v3961_v55  ;;  %v5229_v55 = vld [vmem:[#allocation5 + $0x754] sm:$0xf0]  ;;  %v2549_v63 = vadd.f32 %v2548_v48, %v2536_v41  ;;  %v5655_v3 = vld [vmem:[#allocation5 + $0xba8] sm:$0x11]  ;;  %v4649_v11 = vor.u32 %v5313_v62, %v4648_v60 }
 0x101   :  { %2789 = vmatpush.bf16.msrb.mxu3 %v4089_v57  ;;  %v4520_v57 = vld [vmem:[#allocation5 + $0x8e8] sm:$0xf]  ;;  %v5193_v2 = vld [vmem:[#allocation5 + $0x634] sm:$0xf0] }
 0x102   :  { %2801 = vmatpush.bf16.msrb.mxu0 %v4233_v0  ;;  %v3897_v0 = vor.u32 %v5125_v51, %v3896_v46  ;;  %v5657_v8 = vadd.f32 %v2561_v26, %v2549_v63  ;;  %v4521_v9 = vor.u32 %v5281_v59, %v4520_v57  ;;  %v4296_v12 = vld [vmem:[#allocation5 + $0x728] sm:$0xf]  ;;  %v4169_v16 = vor.u32 %v5193_v2, %v4168_v1  ;;  %v5277_v17 = vld [vmem:[#allocation5 + $0x8d4] sm:$0xf0] }
 0x103   :  { %2814 = vmatpush.bf16.msrb.mxu1 %v4361_v7  ;;  %v2524_v7 = vpop.f32.mrf.mxu0  ;;  %v4504_v14 = vld [vmem:[#allocation5 + $0x8c8] sm:$0xf]  ;;  %v5309_v19 = vld [vmem:[#allocation5 + $0x9d4] sm:$0xf0] }
 0x104   :  { %2777 = vmatpush.bf16.msrb.mxu2 %v3945_v56  ;;  %v4313_v56 = vor.u32 %v5229_v55, %v4312_v54  ;;  %v5189_v22 = vld [vmem:[#allocation5 + $0x614] sm:$0xf0]  ;;  %v4776_v25 = vld [vmem:[#allocation5 + $0xae8] sm:$0xf]  ;;  %v4505_v27 = vor.u32 %v5277_v17, %v4504_v14 }
 0x105   :  { %2790 = vmatpush.bf16.msrb.mxu3 %v4073_v6  ;;  %v2563_v6 = vpop.f32.mrf.mxu3  ;;  %v5345_v26 = vld [vmem:[#allocation5 + $0xaf4] sm:$0xf0]  ;;  %v4280_v29 = vld [vmem:[#allocation5 + $0x708] sm:$0xf] }
 0x106   :  { %2802 = vmatpush.bf16.msrb.mxu0 %v4217_v13  ;;  %v5225_v13 = vld [vmem:[#allocation5 + $0x734] sm:$0xf0]  ;;  %v4488_v33 = vld [vmem:[#allocation5 + $0x8a8] sm:$0xf] }
 0x107   :  { %2815 = vmatpush.bf16.msrb.mxu1 %v4345_v21  ;;  %v4152_v21 = vld [vmem:[#allocation5 + $0x608] sm:$0xf]  ;;  %v4297_v24 = vor.u32 %v5225_v13, %v4296_v12  ;;  %v5273_v35 = vld [vmem:[#allocation5 + $0x8b4] sm:$0xf0]  ;;  %v2550_v46 = vpop.f32.mrf.mxu2 }
 0x108   :  { %2778 = vmatpush.bf16.msrb.mxu2 %v3929_v18  ;;  %v4632_v18 = vld [vmem:[#allocation5 + $0x9c8] sm:$0xf]  ;;  %v4153_v34 = vor.u32 %v5189_v22, %v4152_v21  ;;  %v5305_v41 = vld [vmem:[#allocation5 + $0x9b4] sm:$0xf0]  ;;  %v4489_v53 = vor.u32 %v5273_v35, %v4488_v33 }
 0x109   :  { %2791 = vmatpush.bf16.msrb.mxu3 %v4057_v20  ;;  %v1640_v20 = vunpack.c.l.b16 %v5655_v3  ;;  %v4633_v28 = vor.u32 %v5309_v19, %v4632_v18  ;;  %v4616_v39 = vld [vmem:[#allocation5 + $0x9a8] sm:$0xf]  ;;  %v5341_v52 = vld [vmem:[#allocation5 + $0xad4] sm:$0xf0] }
 0x10a   :  { %2803 = vmatpush.bf16.msrb.mxu0 %v4201_v30  ;;  %v5221_v30 = vld [vmem:[#allocation5 + $0x714] sm:$0xf0]  ;;  %v4760_v51 = vld [vmem:[#allocation5 + $0xac8] sm:$0xf] }
 0x10b   :  { %2816 = vmatpush.bf16.msrb.mxu1 %v4329_v50  ;;  %v4281_v50 = vor.u32 %v5221_v30, %v4280_v29  ;;  %v4472_v54 = vld [vmem:[#allocation5 + $0x888] sm:$0xf]  ;;  %v5269_v57 = vld [vmem:[#allocation5 + $0x894] sm:$0xf0]  ;;  %v4761_v60 = vor.u32 %v5341_v52, %v4760_v51 }
 0x10c   :  { %2779 = vmatpush.bf16.msrb.mxu2 %v3913_v44  ;;  %v2016_v44 = vpack.c.b16 %v1640_v20, %v1640_v20  ;;  %v4600_v48 = vld [vmem:[#allocation5 + $0x988] sm:$0xf]  ;;  %v5301_v59 = vld [vmem:[#allocation5 + $0x994] sm:$0xf0]  ;;  %v4473_v2 = vor.u32 %v5269_v57, %v4472_v54 }
 0x10d   :  { %2792 = vmatpush.bf16.msrb.mxu3 %v4041_v49  ;;  %v4777_v49 = vor.u32 %v5345_v26, %v4776_v25  ;;  %v4856_v62 = vld [vmem:[#allocation5 + $0xb88] sm:$0xf]  ;;  %v5365_v63 = vld [vmem:[#allocation5 + $0xb94] sm:$0xf0]  ;;  %v513_v25 = vperm.slane %v5640_v45, 1 }
 0x10e   :  { %2804 = vmatpush.bf16.msrb.mxu0 %v4185_v5  ;;  %v4617_v5 = vor.u32 %v5305_v41, %v4616_v39  ;;  %v2404_v55 = vand.u32 %v5602_v23, %v2016_v44  ;;  %v5337_v1 = vld [vmem:[#allocation5 + $0xab4] sm:$0xf0]  ;;  %v4857_v6 = vor.u32 %v5365_v63, %v4856_v62  ;;  %v4840_v13 = vld [vmem:[#allocation5 + $0xb68] sm:$0xf] }
 0x10f   :  { %2817 = vmatpush.bf16.msrb.mxu1 %v4313_v56  ;;  %v4456_v56 = vld [vmem:[#allocation5 + $0x868] sm:$0xf]  ;;  %v5265_v7 = vld [vmem:[#allocation5 + $0x874] sm:$0xf0] }
 0x110   :  { %2780 = vmatpush.bf16.msrb.mxu2 %v3897_v0  ;;  %v4744_v0 = vld [vmem:[#allocation5 + $0xaa8] sm:$0xf]  ;;  %v5361_v14 = vld [vmem:[#allocation5 + $0xb74] sm:$0xf0]  ;;  %v4457_v17 = vor.u32 %v5265_v7, %v4456_v56  ;;  %v5023_v7 = vld [vmem:[#allocation5 + $0xec] sm:$0xf] }
 0x111   :  { %2793 = vmatpush.bf16.msrb.mxu3 %v4025_v4  ;;  %v4601_v4 = vor.u32 %v5301_v59, %v4600_v48  ;;  %v4745_v12 = vor.u32 %v5337_v1, %v4744_v0  ;;  %v4728_v15 = vld [vmem:[#allocation5 + $0xa88] sm:$0xf]  ;;  %v5261_v20 = vld [vmem:[#allocation5 + $0x854] sm:$0xf0]  ;;  %v4841_v21 = vor.u32 %v5361_v14, %v4840_v13  ;;  %v5087_v13 = vld [vmem:[#allocation5 + $0x2ec] sm:$0xf] }
 0x112   :  { %2805 = vmatpush.bf16.msrb.mxu0 %v4169_v16  ;;  %v5333_v16 = vld [vmem:[#allocation5 + $0xa94] sm:$0xf0]  ;;  %v4440_v19 = vld [vmem:[#allocation5 + $0x848] sm:$0xf]  ;;  %v3754_v14 = vld [vmem:[#allocation5 + $0x2f8] sm:$0xf0] }
 0x113   :  { %2781 = vmatmul.bf16.vlgmr.msrb.gmra.mxu2 %v5610_v58  ;;  %2818 = vmatpush.bf16.msrb.mxu1 %v4297_v24  ;;  %v4568_v22 = vld [vmem:[#allocation5 + $0x948] sm:$0xf]  ;;  %v5293_v24 = vld [vmem:[#allocation5 + $0x954] sm:$0xf0]  ;;  %v4729_v26 = vor.u32 %v5333_v16, %v4728_v15  ;;  %v4441_v33 = vor.u32 %v5261_v20, %v4440_v19 }
 0x114   :  { %2825 = vmatpush.bf16.msra.mxu2 %v4521_v9  ;;  %2794 = vmatmul.bf16.vlgmr.msrb.gmra.mxu3 %v5613_v61  ;;  %v4584_v9 = vld [vmem:[#allocation5 + $0x968] sm:$0xf]  ;;  %v5329_v30 = vld [vmem:[#allocation5 + $0xa74] sm:$0xf0] }
 0x115   :  { %2838 = vmatpush.bf16.msra.mxu3 %v4649_v11  ;;  %v5297_v11 = vld [vmem:[#allocation5 + $0x974] sm:$0xf0]  ;;  %v4712_v29 = vld [vmem:[#allocation5 + $0xa68] sm:$0xf] }
 0x116   :  { %2806 = vmatpush.bf16.msrb.mxu0 %v4153_v34  ;;  %v4585_v18 = vor.u32 %v5297_v11, %v4584_v9  ;;  %v4569_v34 = vor.u32 %v5293_v24, %v4568_v22  ;;  %v4424_v35 = vld [vmem:[#allocation5 + $0x828] sm:$0xf]  ;;  %v2587_v41 = vpop.f32.mrf.mxu0  ;;  %v5257_v46 = vld [vmem:[#allocation5 + $0x834] sm:$0xf0]  ;;  %v4713_v52 = vor.u32 %v5329_v30, %v4712_v29  ;;  %v5055_v9 = vld [vmem:[#allocation5 + $0x1ec] sm:$0xf] }
 0x117   :  { %2819 = vmatpush.bf16.msrb.mxu1 %v4281_v50  ;;  %v2574_v39 = vpop.f32.mrf.mxu3  ;;  %v5289_v50 = vld [vmem:[#allocation5 + $0x934] sm:$0xf0]  ;;  %v2600_v45 = vpop.f32.mrf.mxu1  ;;  %v4696_v54 = vld [vmem:[#allocation5 + $0xa48] sm:$0xf]  ;;  %v4425_v48 = vor.u32 %v5257_v46, %v4424_v35  ;;  %v3626_v11 = vld [vmem:[#allocation5 + $0x1f8] sm:$0xf0] }
 0x118   :  { %2826 = vmatpush.bf16.msra.mxu2 %v4505_v27  ;;  %v4824_v27 = vld [vmem:[#allocation5 + $0xb48] sm:$0xf]  ;;  %v2575_v51 = vadd.f32 %v2574_v39, %v513_v25  ;;  %v5253_v62 = vld [vmem:[#allocation5 + $0x814] sm:$0xf0]  ;;  %v3629_v25 = vor.u32 %v5055_v9, %v3626_v11  ;;  %v5019_v29 = vld [vmem:[#allocation5 + $0xcc] sm:$0xf] }
 0x119   :  { %2839 = vmatpush.bf16.msra.mxu3 %v4633_v28  ;;  %2807 = vmatmul.bf16.vlgmr.msrb.gmra.mxu0 %v5605_v37  ;;  %v5357_v28 = vld [vmem:[#allocation5 + $0xb54] sm:$0xf0]  ;;  %v4536_v63 = vld [vmem:[#allocation5 + $0x908] sm:$0xf]  ;;  %v5051_v30 = vld [vmem:[#allocation5 + $0x1cc] sm:$0xf] }
 0x11a   :  { %2851 = vmatpush.bf16.msra.mxu0 %v4777_v49  ;;  %2820 = vmatmul.bf16.vlgmr.msrb.gmra.mxu1 %v5607_v42  ;;  %v4825_v44 = vor.u32 %v5357_v28, %v4824_v27  ;;  %v4552_v49 = vld [vmem:[#allocation5 + $0x928] sm:$0xf]  ;;  %v2588_v57 = vadd.f32 %v2587_v41, %v2575_v51  ;;  %v5285_v1 = vld [vmem:[#allocation5 + $0x914] sm:$0xf0]  ;;  %v3757_v28 = vor.u32 %v5087_v13, %v3754_v14  ;;  %v3482_v35 = vld [vmem:[#allocation5 + $0xd8] sm:$0xf0] }
 0x11b   :  { %2866 = vmatpush.bf16.msra.mxu1 %v2404_v55  ;;  %v5325_v55 = vld [vmem:[#allocation5 + $0xa54] sm:$0xf0]  ;;  %v4553_v59 = vor.u32 %v5289_v50, %v4552_v49  ;;  %v5083_v39 = vld [vmem:[#allocation5 + $0x2cc] sm:$0xf]  ;;  %v3738_v41 = vld [vmem:[#allocation5 + $0x2d8] sm:$0xf0] }
 0x11c   :  { %2827 = vmatpush.bf16.msra.mxu2 %v4489_v53  ;;  %v4808_v53 = vld [vmem:[#allocation5 + $0xb28] sm:$0xf]  ;;  %v2601_v56 = vadd.f32 %v2600_v45, %v2588_v57  ;;  %v5321_v19 = vld [vmem:[#allocation5 + $0xa34] sm:$0xf0]  ;;  %v5119_v50 = vld [vmem:[#allocation5 + $0x3ec] sm:$0xf]  ;;  %v3485_v45 = vor.u32 %v5019_v29, %v3482_v35 }
 0x11d   :  { %2840 = vmatpush.bf16.msra.mxu3 %v4617_v5  ;;  %v5353_v5 = vld [vmem:[#allocation5 + $0xb34] sm:$0xf0]  ;;  %v3882_v51 = vld [vmem:[#allocation5 + $0x3f8] sm:$0xf0]  ;;  %v5075_v11 = vld [vmem:[#allocation5 + $0x28c] sm:$0xf] }
 0x11e   :  { %2852 = vmatpush.bf16.msra.mxu0 %v4761_v60  ;;  %v4408_v60 = vld [vmem:[#allocation5 + $0x808] sm:$0xf]  ;;  %v4809_v0 = vor.u32 %v5353_v5, %v4808_v53  ;;  %v2613_v15 = vpop.f32.mrf.mxu2  ;;  %v2589_v22 = vpop.f32.mrf.mxu0  ;;  %v5317_v46 = vld [vmem:[#allocation5 + $0xa14] sm:$0xf0]  ;;  %v5015_v53 = vld [vmem:[#allocation5 + $0xac] sm:$0xf] }
 0x11f   :  { %2867 = vmatpush.bf16.msra.mxu1 %v4857_v6  ;;  %v4697_v6 = vor.u32 %v5325_v55, %v4696_v54  ;;  %v4409_v16 = vor.u32 %v5253_v62, %v4408_v60  ;;  %v5666_v20 = vadd.f32 %v2613_v15, %v2601_v56  ;;  %v5047_v5 = vld [vmem:[#allocation5 + $0x1ac] sm:$0xf]  ;;  %v3594_v54 = vld [vmem:[#allocation5 + $0x1b8] sm:$0xf0]  ;;  %v3885_v62 = vor.u32 %v5119_v50, %v3882_v51 }
 0x120   :  { %2828 = vmatpush.bf16.msra.mxu2 %v4473_v2  ;;  %v4792_v2 = vld [vmem:[#allocation5 + $0xb08] sm:$0xf]  ;;  %v3466_v57 = vld [vmem:[#allocation5 + $0xb8] sm:$0xf0]  ;;  %v5011_v56 = vld [vmem:[#allocation5 + $0x8c] sm:$0xf] }
 0x121   :  { %2841 = vmatpush.bf16.msra.mxu3 %v4601_v4  ;;  %v5349_v4 = vld [vmem:[#allocation5 + $0xb14] sm:$0xf0]  ;;  %v3450_v9 = vld [vmem:[#allocation5 + $0x98] sm:$0xf0]  ;;  %v5111_v15 = vld [vmem:[#allocation5 + $0x3ac] sm:$0xf] }
 0x122   :  { %2853 = vmatpush.bf16.msra.mxu0 %v4745_v12  ;;  %v3498_v12 = vld [vmem:[#allocation5 + $0xf8] sm:$0xf0]  ;;  %v4793_v24 = vor.u32 %v5349_v4, %v4792_v2  ;;  %v3469_v2 = vor.u32 %v5015_v53, %v3466_v57  ;;  %v5107_v29 = vld [vmem:[#allocation5 + $0x38c] sm:$0xf] }
 0x123   :  { %2868 = vmatpush.bf16.msra.mxu1 %v4841_v21  ;;  %v2576_v21 = vpop.f32.mrf.mxu3  ;;  %v3501_v27 = vor.u32 %v5023_v7, %v3498_v12  ;;  %v3578_v7 = vld [vmem:[#allocation5 + $0x198] sm:$0xf0]  ;;  %v5003_v35 = vld [vmem:[#allocation5 + $0x4c] sm:$0xf] }
 0x124   :  { %2829 = vmatpush.bf16.msra.mxu2 %v4457_v17  ;;  %v4537_v17 = vor.u32 %v5285_v1, %v4536_v63  ;;  %v3597_v63 = vor.u32 %v5047_v5, %v3594_v54  ;;  %v3866_v1 = vld [vmem:[#allocation5 + $0x3d8] sm:$0xf0]  ;;  %v5039_v21 = vld [vmem:[#allocation5 + $0x16c] sm:$0xf] }
 0x125   :  { %2842 = vmatpush.bf16.msra.mxu3 %v4585_v18  ;;  %v4680_v18 = vld [vmem:[#allocation5 + $0xa28] sm:$0xf]  ;;  %v3706_v12 = vld [vmem:[#allocation5 + $0x298] sm:$0xf0]  ;;  %v4999_v57 = vld [vmem:[#allocation5 + $0x2c] sm:$0xf] }
 0x126   :  { %2854 = vmatpush.bf16.msra.mxu0 %v4729_v26  ;;  %v2602_v26 = vpop.f32.mrf.mxu1  ;;  %v2615_v60 = vpop.f32.mrf.mxu2  ;;  %v3562_v22 = vld [vmem:[#allocation5 + $0x178] sm:$0xf0] }
 0x127   :  { %2869 = vmatpush.bf16.msra.mxu1 %v4825_v44  ;;  %v4664_v44 = vld [vmem:[#allocation5 + $0xa08] sm:$0xf]  ;;  %v3690_v26 = vld [vmem:[#allocation5 + $0x278] sm:$0xf0] }
 0x128   :  { %2830 = vmatpush.bf16.msra.mxu2 %v4441_v33  ;;  %v3610_v33 = vld [vmem:[#allocation5 + $0x1d8] sm:$0xf0]  ;;  %v4665_v55 = vor.u32 %v5317_v46, %v4664_v44  ;;  %v5067_v46 = vld [vmem:[#allocation5 + $0x24c] sm:$0xf] }
 0x129   :  { %2843 = vmatpush.bf16.msra.mxu3 %v4569_v34  ;;  %v4681_v34 = vor.u32 %v5321_v19, %v4680_v18  ;;  %v3613_v49 = vor.u32 %v5051_v30, %v3610_v33  ;;  %v3709_v18 = vor.u32 %v5075_v11, %v3706_v12  ;;  %v5007_v19 = vld [vmem:[#allocation5 + $0x6c] sm:$0xf]  ;;  %v3834_v30 = vld [vmem:[#allocation5 + $0x398] sm:$0xf0] }
 0x12a   :  { %2855 = vmatpush.bf16.msra.mxu0 %v4713_v52  ;;  %v3741_v52 = vor.u32 %v5083_v39, %v3738_v41  ;;  %v5035_v39 = vld [vmem:[#allocation5 + $0x14c] sm:$0xf]  ;;  %v3546_v41 = vld [vmem:[#allocation5 + $0x158] sm:$0xf0]  ;;  %v3837_v50 = vor.u32 %v5107_v29, %v3834_v30 }
 0x12b   :  { %2870 = vmatpush.bf16.msra.mxu1 %v4809_v0  ;;  %v5115_v0 = vld [vmem:[#allocation5 + $0x3cc] sm:$0xf]  ;;  %v3418_v44 = vld [vmem:[#allocation5 + $0x58] sm:$0xf0] }
 0x12c   :  { %2831 = vmatpush.bf16.msra.mxu2 %v4425_v48  ;;  %v5079_v48 = vld [vmem:[#allocation5 + $0x2ac] sm:$0xf]  ;;  %v3869_v13 = vor.u32 %v5115_v0, %v3866_v1  ;;  %v3818_v53 = vld [vmem:[#allocation5 + $0x378] sm:$0xf0]  ;;  %v3421_v54 = vor.u32 %v5003_v35, %v3418_v44 }
 0x12d   :  { %2844 = vmatpush.bf16.msra.mxu3 %v4553_v59  ;;  %v3722_v59 = vld [vmem:[#allocation5 + $0x2b8] sm:$0xf0]  ;;  %v5063_v0 = vld [vmem:[#allocation5 + $0x22c] sm:$0xf] }
 0x12e   :  { %2856 = vmatpush.bf16.msra.mxu0 %v4697_v6  ;;  %v3725_v4 = vor.u32 %v5079_v48, %v3722_v59  ;;  %v5043_v6 = vld [vmem:[#allocation5 + $0x18c] sm:$0xf]  ;;  %v3530_v59 = vld [vmem:[#allocation5 + $0x138] sm:$0xf0] }
 0x12f   :  { %2871 = vmatpush.bf16.msra.mxu1 %v4793_v24  ;;  %v3581_v14 = vor.u32 %v5043_v6, %v3578_v7  ;;  %v3434_v24 = vld [vmem:[#allocation5 + $0x78] sm:$0xf0]  ;;  %v5031_v48 = vld [vmem:[#allocation5 + $0x12c] sm:$0xf] }
 0x130   :  { %2832 = vmatpush.bf16.msra.mxu2 %v4409_v16  ;;  %v3850_v16 = vld [vmem:[#allocation5 + $0x3b8] sm:$0xf0]  ;;  %v3437_v33 = vor.u32 %v5007_v19, %v3434_v24  ;;  %v4995_v6 = vld [vmem:[#allocation5 + $0xc] sm:$0xf] }
 0x131   :  { %2845 = vmatpush.bf16.msra.mxu3 %v4537_v17  ;;  %v3453_v17 = vor.u32 %v5011_v56, %v3450_v9  ;;  %v3658_v1 = vld [vmem:[#allocation5 + $0x238] sm:$0xf0]  ;;  %v3533_v56 = vor.u32 %v5031_v48, %v3530_v59  ;;  %v5095_v30 = vld [vmem:[#allocation5 + $0x32c] sm:$0xf] }
 0x132   :  { %2857 = vmatpush.bf16.msra.mxu0 %v4681_v34  ;;  %4864 = vmatmul.msk.bf16.vlgmr.msra.gmra.mxu1 %vm2390_vm1, %v5617_v10  ;;  %v3386_v7 = vld [vmem:[#allocation5 + $0x18] sm:$0xf0]  ;;  %v5247_v59 = vld [vmem:[#allocation5 + $0x7ec] sm:$0xf] }
 0x133   :  { %2877 = vmatpush.bf16.msrb.mxu1 %v3501_v27  ;;  %2833 = vmatmul.bf16.vlgmr.msra.gmra.mxu2 %v5621_v31  ;;  %v3853_v27 = vor.u32 %v5111_v15, %v3850_v16  ;;  %v3802_v9 = vld [vmem:[#allocation5 + $0x358] sm:$0xf0]  ;;  %v5059_v16 = vld [vmem:[#allocation5 + $0x20c] sm:$0xf] }
 0x134   :  { %2890 = vmatpush.bf16.msrb.mxu2 %v3629_v25  ;;  %2846 = vmatmul.bf16.vlgmr.msra.gmra.mxu3 %v5625_v36  ;;  %v5071_v25 = vld [vmem:[#allocation5 + $0x26c] sm:$0xf]  ;;  %v3514_v15 = vld [vmem:[#allocation5 + $0x118] sm:$0xf0] }
 0x135   :  { %2903 = vmatpush.bf16.msrb.mxu3 %v3757_v28  ;;  %v3565_v28 = vor.u32 %v5039_v21, %v3562_v22  ;;  %v3693_v34 = vor.u32 %v5071_v25, %v3690_v26  ;;  %v4010_v19 = vld [vmem:[#allocation5 + $0x4f8] sm:$0xf0]  ;;  %v5183_v22 = vld [vmem:[#allocation5 + $0x5ec] sm:$0xf] }
 0x136   :  { %2858 = vmatpush.bf16.msra.mxu0 %v4665_v55  ;;  %v2639_v60 = vpop.f32.mrf.mxu0  ;;  %v4138_v24 = vld [vmem:[#allocation5 + $0x5f8] sm:$0xf0]  ;;  %v5215_v25 = vld [vmem:[#allocation5 + $0x6ec] sm:$0xf] }
 0x137   :  { %2878 = vmatpush.bf16.msrb.mxu1 %v3485_v45  ;;  %v2626_v51 = vpop.f32.mrf.mxu3  ;;  %v3549_v45 = vor.u32 %v5035_v39, %v3546_v41  ;;  %v3770_v48 = vld [vmem:[#allocation5 + $0x318] sm:$0xf0] }
 0x138   :  { %2891 = vmatpush.bf16.msrb.mxu2 %v3613_v49  ;;  %v3674_v49 = vld [vmem:[#allocation5 + $0x258] sm:$0xf0]  ;;  %v2627_v5 = vadd.f32 %v2626_v51, %v5666_v20  ;;  %v5099_v20 = vld [vmem:[#allocation5 + $0x34c] sm:$0xf] }
 0x139   :  { %2904 = vmatpush.bf16.msrb.mxu3 %v3741_v52  ;;  %2859 = vmatmul.bf16.vlgmr.msra.gmra.mxu0 %v5623_v32  ;;  %v5103_v52 = vld [vmem:[#allocation5 + $0x36c] sm:$0xf]  ;;  %v3677_v55 = vor.u32 %v5067_v46, %v3674_v49  ;;  %v3805_v21 = vor.u32 %v5099_v20, %v3802_v9  ;;  %v4141_v49 = vor.u32 %v5183_v22, %v4138_v24  ;;  %v3994_v51 = vld [vmem:[#allocation5 + $0x4d8] sm:$0xf0] }
 0x13a   :  { %2916 = vmatpush.bf16.msrb.mxu0 %v3885_v62  ;;  %v2652_v62 = vpop.f32.mrf.mxu1  ;;  %v4234_v20 = vld [vmem:[#allocation5 + $0x6b8] sm:$0xf0]  ;;  %v5203_v22 = vld [vmem:[#allocation5 + $0x68c] sm:$0xf] }
 0x13b   :  { %2879 = vmatpush.bf16.msrb.mxu1 %v3469_v2  ;;  %v2640_v2 = vadd.f32 %v2639_v60, %v2627_v5  ;;  %v4122_v5 = vld [vmem:[#allocation5 + $0x5d8] sm:$0xf0] }
 0x13c   :  { %2892 = vmatpush.bf16.msrb.mxu2 %v3597_v63  ;;  %v3402_v63 = vld [vmem:[#allocation5 + $0x38] sm:$0xf0] }
 0x13d   :  { %2905 = vmatpush.bf16.msrb.mxu3 %v3725_v4  ;;  %v3821_v4 = vor.u32 %v5103_v52, %v3818_v53  ;;  %v2653_v11 = vadd.f32 %v2652_v62, %v2640_v2  ;;  %v3405_v12 = vor.u32 %v4999_v57, %v3402_v63  ;;  %v5179_v53 = vld [vmem:[#allocation5 + $0x5cc] sm:$0xf]  ;;  %v4394_v60 = vld [vmem:[#allocation5 + $0x7f8] sm:$0xf0] }
 0x13e   :  { %2917 = vmatpush.bf16.msrb.mxu0 %v3869_v13  ;;  %v3661_v13 = vor.u32 %v5063_v0, %v3658_v1  ;;  %v2665_v29 = vpop.f32.mrf.mxu2  ;;  %v2641_v41 = vpop.f32.mrf.mxu0  ;;  %v5091_v57 = vld [vmem:[#allocation5 + $0x30c] sm:$0xf]  ;;  %v4125_v63 = vor.u32 %v5179_v53, %v4122_v5  ;;  %v4397_v9 = vor.u32 %v5247_v59, %v4394_v60  ;;  %v4058_v5 = vld [vmem:[#allocation5 + $0x558] sm:$0xf0] }
 0x13f   :  { %2880 = vmatpush.bf16.msrb.mxu1 %v3453_v17  ;;  %v3642_v17 = vld [vmem:[#allocation5 + $0x218] sm:$0xf0]  ;;  %v2628_v26 = vpop.f32.mrf.mxu3  ;;  %v5674_v39 = vadd.f32 %v2665_v29, %v2653_v11  ;;  %v5143_v0 = vld [vmem:[#allocation5 + $0x4ac] sm:$0xf]  ;;  %v3773_v2 = vor.u32 %v5091_v57, %v3770_v48 }
 0x140   :  { %2893 = vmatpush.bf16.msrb.mxu2 %v3581_v14  ;;  %v5027_v14 = vld [vmem:[#allocation5 + $0x10c] sm:$0xf]  ;;  %v3645_v35 = vor.u32 %v5059_v16, %v3642_v17  ;;  %v3946_v29 = vld [vmem:[#allocation5 + $0x478] sm:$0xf0] }
 0x141   :  { %2906 = vmatpush.bf16.msrb.mxu3 %v3709_v18  ;;  %v5151_v18 = vld [vmem:[#allocation5 + $0x4ec] sm:$0xf] }
 0x142   :  { %2918 = vmatpush.bf16.msrb.mxu0 %v3853_v27  ;;  %v3517_v27 = vor.u32 %v5027_v14, %v3514_v15  ;;  %v2654_v44 = vpop.f32.mrf.mxu1  ;;  %v4013_v46 = vor.u32 %v5151_v18, %v4010_v19  ;;  %v5139_v16 = vld [vmem:[#allocation5 + $0x48c] sm:$0xf]  ;;  %v3962_v18 = vld [vmem:[#allocation5 + $0x498] sm:$0xf0] }
 0x143   :  { %2881 = vmatpush.bf16.msrb.mxu1 %v3437_v33  ;;  %v3786_v33 = vld [vmem:[#allocation5 + $0x338] sm:$0xf0]  ;;  %v5171_v19 = vld [vmem:[#allocation5 + $0x58c] sm:$0xf] }
 0x144   :  { %2894 = vmatpush.bf16.msrb.mxu2 %v3565_v28  ;;  %v4266_v28 = vld [vmem:[#allocation5 + $0x6f8] sm:$0xf0]  ;;  %v3789_v52 = vor.u32 %v5095_v30, %v3786_v33  ;;  %v5167_v30 = vld [vmem:[#allocation5 + $0x56c] sm:$0xf] }
 0x145   :  { %2907 = vmatpush.bf16.msrb.mxu3 %v3693_v34  ;;  %v3389_v34 = vor.u32 %v4995_v6, %v3386_v7  ;;  %v4106_v6 = vld [vmem:[#allocation5 + $0x5b8] sm:$0xf0]  ;;  %v5207_v7 = vld [vmem:[#allocation5 + $0x6ac] sm:$0xf] }
 0x146   :  { %2919 = vmatpush.bf16.msrb.mxu0 %v3837_v50  ;;  %v5147_v50 = vld [vmem:[#allocation5 + $0x4cc] sm:$0xf]  ;;  %v2667_v11 = vpop.f32.mrf.mxu2  ;;  %v4237_v17 = vor.u32 %v5207_v7, %v4234_v20  ;;  %v4074_v33 = vld [vmem:[#allocation5 + $0x578] sm:$0xf0] }
 0x147   :  { %2882 = vmatpush.bf16.msrb.mxu1 %v3421_v54  ;;  %v5211_v54 = vld [vmem:[#allocation5 + $0x6cc] sm:$0xf]  ;;  %v3997_v62 = vor.u32 %v5147_v50, %v3994_v51  ;;  %v4077_v50 = vor.u32 %v5167_v30, %v4074_v33  ;;  %v3914_v7 = vld [vmem:[#allocation5 + $0x438] sm:$0xf0] }
 0x148   :  { %2895 = vmatpush.bf16.msrb.mxu2 %v3549_v45  ;;  %v4269_v45 = vor.u32 %v5215_v25, %v4266_v28  ;;  %v4362_v25 = vld [vmem:[#allocation5 + $0x7b8] sm:$0xf0]  ;;  %v5235_v44 = vld [vmem:[#allocation5 + $0x78c] sm:$0xf] }
 0x149   :  { %2908 = vmatpush.bf16.msrb.mxu3 %v3677_v55  ;;  %v4250_v55 = vld [vmem:[#allocation5 + $0x6d8] sm:$0xf0]  ;;  %v5131_v51 = vld [vmem:[#allocation5 + $0x44c] sm:$0xf] }
 0x14a   :  { %2920 = vmatpush.bf16.msrb.mxu0 %v3821_v4  ;;  %v4253_v1 = vor.u32 %v5211_v54, %v4250_v55  ;;  %v3978_v4 = vld [vmem:[#allocation5 + $0x4b8] sm:$0xf0]  ;;  %v5163_v53 = vld [vmem:[#allocation5 + $0x54c] sm:$0xf] }
 0x14b   :  { %2883 = vmatpush.bf16.msrb.mxu1 %v3405_v12  ;;  %v5243_v12 = vld [vmem:[#allocation5 + $0x7cc] sm:$0xf]  ;;  %v3981_v14 = vor.u32 %v5143_v0, %v3978_v4  ;;  %v4650_v30 = vld [vmem:[#allocation5 + $0x9f8] sm:$0xf0] }
 0x14c   :  { %2896 = vmatpush.bf16.msrb.mxu2 %v3533_v56  ;;  %v5175_v56 = vld [vmem:[#allocation5 + $0x5ac] sm:$0xf] }
 0x14d   :  { %2909 = vmatpush.bf16.msrb.mxu3 %v3661_v13  ;;  %v4378_v13 = vld [vmem:[#allocation5 + $0x7d8] sm:$0xf0]  ;;  %v4109_v15 = vor.u32 %v5175_v56, %v4106_v6  ;;  %v5195_v55 = vld [vmem:[#allocation5 + $0x64c] sm:$0xf] }
 0x14e   :  { %2921 = vmatpush.bf16.msrb.mxu0 %v3805_v21  ;;  %v4090_v21 = vld [vmem:[#allocation5 + $0x598] sm:$0xf0]  ;;  %v4381_v24 = vor.u32 %v5243_v12, %v4378_v13  ;;  %v5231_v60 = vld [vmem:[#allocation5 + $0x76c] sm:$0xf] }
 0x14f   :  { %2884 = vmatpush.bf16.msrb.mxu1 %v3389_v34  ;;  %v4093_v26 = vor.u32 %v5171_v19, %v4090_v21  ;;  %v5199_v34 = vld [vmem:[#allocation5 + $0x66c] sm:$0xf]  ;;  %v4170_v12 = vld [vmem:[#allocation5 + $0x638] sm:$0xf0] }
 0x150   :  { %2897 = vmatpush.bf16.msrb.mxu2 %v3517_v27  ;;  %v5135_v27 = vld [vmem:[#allocation5 + $0x46c] sm:$0xf]  ;;  %v3898_v19 = vld [vmem:[#allocation5 + $0x418] sm:$0xf0] }
 0x151   :  { %2910 = vmatpush.bf16.msrb.mxu3 %v3645_v35  ;;  %v4202_v35 = vld [vmem:[#allocation5 + $0x678] sm:$0xf0]  ;;  %v5159_v20 = vld [vmem:[#allocation5 + $0x52c] sm:$0xf] }
 0x152   :  { %2922 = vmatpush.bf16.msrb.mxu0 %v3789_v52  ;;  %2885 = vmatmul.bf16.vlgmr.msrb.gmra.mxu1 %v5590_v43  ;;  %v3965_v43 = vor.u32 %v5139_v16, %v3962_v18  ;;  %v3930_v52 = vld [vmem:[#allocation5 + $0x458] sm:$0xf0]  ;;  %v5191_v11 = vld [vmem:[#allocation5 + $0x62c] sm:$0xf] }
 0x153   :  { %2929 = vmatpush.bf16.msra.mxu1 %v4013_v46  ;;  %2898 = vmatmul.bf16.vlgmr.msrb.gmra.mxu2 %v5594_v47  ;;  %v4218_v47 = vld [vmem:[#allocation5 + $0x698] sm:$0xf0]  ;;  %v3933_v0 = vor.u32 %v5131_v51, %v3930_v52  ;;  %v5123_v18 = vld [vmem:[#allocation5 + $0x40c] sm:$0xf] }
 0x154   :  { %2942 = vmatpush.bf16.msra.mxu2 %v4141_v49  ;;  %2911 = vmatmul.bf16.vlgmr.msrb.gmra.mxu3 %v5586_v38  ;;  %v5239_v38 = vld [vmem:[#allocation5 + $0x7ac] sm:$0xf]  ;;  %v4221_v28 = vor.u32 %v5203_v22, %v4218_v47  ;;  %v4346_v46 = vld [vmem:[#allocation5 + $0x798] sm:$0xf0]  ;;  %v3949_v49 = vor.u32 %v5135_v27, %v3946_v29  ;;  %v4173_v47 = vor.u32 %v5191_v11, %v4170_v12 }
 0x155   :  { %2955 = vmatpush.bf16.msra.mxu3 %v4269_v45  ;;  %v4365_v41 = vor.u32 %v5239_v38, %v4362_v25  ;;  %v4205_v45 = vor.u32 %v5199_v34, %v4202_v35  ;;  %v4349_v57 = vor.u32 %v5235_v44, %v4346_v46  ;;  %v5155_v21 = vld [vmem:[#allocation5 + $0x50c] sm:$0xf]  ;;  %v4154_v25 = vld [vmem:[#allocation5 + $0x618] sm:$0xf0] }
 0x156   :  { %2923 = vmatpush.bf16.msrb.mxu0 %v3773_v2  ;;  %v2717_v59 = vpop.f32.mrf.mxu2  ;;  %v5127_v2 = vld [vmem:[#allocation5 + $0x42c] sm:$0xf]  ;;  %v4522_v27 = vld [vmem:[#allocation5 + $0x8f8] sm:$0xf0] }
 0x157   :  { %2930 = vmatpush.bf16.msra.mxu1 %v3997_v62  ;;  %v2678_v54 = vpop.f32.mrf.mxu3  ;;  %v4330_v62 = vld [vmem:[#allocation5 + $0x778] sm:$0xf0]  ;;  %v2704_v6 = vpop.f32.mrf.mxu1  ;;  %v3917_v16 = vor.u32 %v5127_v2, %v3914_v7  ;;  %v5187_v38 = vld [vmem:[#allocation5 + $0x60c] sm:$0xf] }
 0x158   :  { %2943 = vmatpush.bf16.msra.mxu2 %v4125_v63  ;;  %v2679_v48 = vadd.f32 %v2678_v54, %v5674_v39  ;;  %v2691_v63 = vpop.f32.mrf.mxu0  ;;  %v4333_v39 = vor.u32 %v5231_v60, %v4330_v62  ;;  %v5343_v33 = vld [vmem:[#allocation5 + $0xaec] sm:$0xf]  ;;  %v4778_v34 = vld [vmem:[#allocation5 + $0xaf8] sm:$0xf0] }
 0x159   :  { %2956 = vmatpush.bf16.msra.mxu3 %v4253_v1  ;;  %2924 = vmatmul.bf16.vlgmr.msrb.gmra.mxu0 %v5588_v40  ;;  %v4186_v40 = vld [vmem:[#allocation5 + $0x658] sm:$0xf0]  ;;  %v4061_v1 = vor.u32 %v5163_v53, %v4058_v5  ;;  %v5223_v46 = vld [vmem:[#allocation5 + $0x72c] sm:$0xf]  ;;  %v4781_v54 = vor.u32 %v5343_v33, %v4778_v34 }
 0x15a   :  { %2968 = vmatpush.bf16.msra.mxu0 %v4397_v9  ;;  %v2692_v4 = vadd.f32 %v2691_v63, %v2679_v48  ;;  %v4189_v56 = vor.u32 %v5195_v55, %v4186_v40  ;;  %v4042_v9 = vld [vmem:[#allocation5 + $0x538] sm:$0xf0]  ;;  %v5275_v55 = vld [vmem:[#allocation5 + $0x8cc] sm:$0xf] }
 0x15b   :  { %2931 = vmatpush.bf16.msra.mxu1 %v3981_v14  ;;  %v5227_v14 = vld [vmem:[#allocation5 + $0x74c] sm:$0xf]  ;;  %v4506_v40 = vld [vmem:[#allocation5 + $0x8d8] sm:$0xf0] }
 0x15c   :  { %2944 = vmatpush.bf16.msra.mxu2 %v4109_v15  ;;  %v2705_v13 = vadd.f32 %v2704_v6, %v2692_v4  ;;  %v4314_v15 = vld [vmem:[#allocation5 + $0x758] sm:$0xf0]  ;;  %v5339_v60 = vld [vmem:[#allocation5 + $0xacc] sm:$0xf] }
 0x15d   :  { %2957 = vmatpush.bf16.msra.mxu3 %v4237_v17  ;;  %v4045_v17 = vor.u32 %v5159_v20, %v4042_v9  ;;  %v4762_v62 = vld [vmem:[#allocation5 + $0xad8] sm:$0xf0]  ;;  %v5219_v63 = vld [vmem:[#allocation5 + $0x70c] sm:$0xf] }
 0x15e   :  { %2969 = vmatpush.bf16.msra.mxu0 %v4381_v24  ;;  %v5681_v22 = vadd.f32 %v2717_v59, %v2705_v13  ;;  %v4026_v24 = vld [vmem:[#allocation5 + $0x518] sm:$0xf0]  ;;  %v2719_v35 = vpop.f32.mrf.mxu2  ;;  %v4765_v4 = vor.u32 %v5339_v60, %v4762_v62  ;;  %v5303_v7 = vld [vmem:[#allocation5 + $0x9ac] sm:$0xf] }
 0x15f   :  { %2932 = vmatpush.bf16.msra.mxu1 %v3965_v43  ;;  %v4317_v43 = vor.u32 %v5227_v14, %v4314_v15  ;;  %v2680_v29 = vpop.f32.mrf.mxu3  ;;  %v4029_v44 = vor.u32 %v5155_v21, %v4026_v24  ;;  %v2706_v53 = vpop.f32.mrf.mxu1  ;;  %v4634_v59 = vld [vmem:[#allocation5 + $0x9d8] sm:$0xf0]  ;;  %v5335_v11 = vld [vmem:[#allocation5 + $0xaac] sm:$0xf] }
 0x160   :  { %2945 = vmatpush.bf16.msra.mxu2 %v4093_v26  ;;  %v5279_v26 = vld [vmem:[#allocation5 + $0x8ec] sm:$0xf]  ;;  %v2693_v51 = vpop.f32.mrf.mxu0  ;;  %v4490_v6 = vld [vmem:[#allocation5 + $0x8b8] sm:$0xf0] }
 0x161   :  { %2958 = vmatpush.bf16.msra.mxu3 %v4221_v28  ;;  %v5311_v28 = vld [vmem:[#allocation5 + $0x9ec] sm:$0xf]  ;;  %v4525_v52 = vor.u32 %v5279_v26, %v4522_v27  ;;  %v4618_v9 = vld [vmem:[#allocation5 + $0x9b8] sm:$0xf0] }
 0x162   :  { %2970 = vmatpush.bf16.msra.mxu0 %v4365_v41  ;;  %v3901_v41 = vor.u32 %v5123_v18, %v3898_v19  ;;  %v4653_v5 = vor.u32 %v5311_v28, %v4650_v30  ;;  %v4746_v12 = vld [vmem:[#allocation5 + $0xab8] sm:$0xf0]  ;;  %v5363_v14 = vld [vmem:[#allocation5 + $0xb8c] sm:$0xf] }
 0x163   :  { %2933 = vmatpush.bf16.msra.mxu1 %v3949_v49  ;;  %v4298_v49 = vld [vmem:[#allocation5 + $0x738] sm:$0xf0]  ;;  %v5267_v18 = vld [vmem:[#allocation5 + $0x88c] sm:$0xf] }
 0x164   :  { %2946 = vmatpush.bf16.msra.mxu2 %v4077_v50  ;;  %v1641_v50 = vunpack.c.h.b16 %v5655_v3  ;;  %v4301_v48 = vor.u32 %v5223_v46, %v4298_v49  ;;  %v4858_v15 = vld [vmem:[#allocation5 + $0xb98] sm:$0xf0]  ;;  %v5299_v19 = vld [vmem:[#allocation5 + $0x98c] sm:$0xf] }
 0x165   :  { %2959 = vmatpush.bf16.msra.mxu3 %v4205_v45  ;;  %v4157_v45 = vor.u32 %v5187_v38, %v4154_v25  ;;  %v4602_v21 = vld [vmem:[#allocation5 + $0x998] sm:$0xf0]  ;;  %v5263_v26 = vld [vmem:[#allocation5 + $0x86c] sm:$0xf] }
 0x166   :  { %2971 = vmatpush.bf16.msra.mxu0 %v4349_v57  ;;  %v5307_v57 = vld [vmem:[#allocation5 + $0x9cc] sm:$0xf]  ;;  %v2017_v3 = vpack.c.b16 %v1641_v50, %v1641_v50  ;;  %v4730_v24 = vld [vmem:[#allocation5 + $0xa98] sm:$0xf0]  ;;  %v4605_v25 = vor.u32 %v5299_v19, %v4602_v21 }
 0x167   :  { %2934 = vmatpush.bf16.msra.mxu1 %v3933_v0  ;;  %v4282_v0 = vld [vmem:[#allocation5 + $0x718] sm:$0xf0]  ;;  %v4637_v2 = vor.u32 %v5307_v57, %v4634_v59  ;;  %v5295_v28 = vld [vmem:[#allocation5 + $0x96c] sm:$0xf] }
 0x168   :  { %2947 = vmatpush.bf16.msra.mxu2 %v4061_v1  ;;  %v4509_v1 = vor.u32 %v5275_v55, %v4506_v40  ;;  %v4285_v20 = vor.u32 %v5219_v63, %v4282_v0  ;;  %v4842_v38 = vld [vmem:[#allocation5 + $0xb78] sm:$0xf0]  ;;  %v5327_v30 = vld [vmem:[#allocation5 + $0xa6c] sm:$0xf] }
 0x169   :  { %2960 = vmatpush.bf16.msra.mxu3 %v4189_v56  ;;  %v5271_v56 = vld [vmem:[#allocation5 + $0x8ac] sm:$0xf]  ;;  %v4458_v27 = vld [vmem:[#allocation5 + $0x878] sm:$0xf0] }
 0x16a   :  { %2972 = vmatpush.bf16.msra.mxu0 %v4333_v39  ;;  %v2407_v39 = vand.u32 %v5602_v23, %v2017_v3  ;;  %v4493_v13 = vor.u32 %v5271_v56, %v4490_v6  ;;  %v4861_v23 = vor.u32 %v5363_v14, %v4858_v15  ;;  %v4586_v29 = vld [vmem:[#allocation5 + $0x978] sm:$0xf0]  ;;  %v4461_v35 = vor.u32 %v5263_v26, %v4458_v27  ;;  %v5259_v50 = vld [vmem:[#allocation5 + $0x84c] sm:$0xf] }
 0x16b   :  { %2935 = vmatpush.bf16.msra.mxu1 %v3917_v16  ;;  %v4621_v16 = vor.u32 %v5303_v7, %v4618_v9  ;;  %v4714_v33 = vld [vmem:[#allocation5 + $0xa78] sm:$0xf0]  ;;  %v4589_v46 = vor.u32 %v5295_v28, %v4586_v29  ;;  %v5323_v53 = vld [vmem:[#allocation5 + $0xa4c] sm:$0xf]  ;;  %v5379_v28 = vld [vmem:[%s5814_s3 + $0x68] sm:$0xff] }
 0x16c   :  { %2948 = vmatpush.bf16.msra.mxu2 %v4045_v17  ;;  %v4749_v17 = vor.u32 %v5335_v11, %v4746_v12  ;;  %v4717_v49 = vor.u32 %v5327_v30, %v4714_v33  ;;  %v4442_v51 = vld [vmem:[#allocation5 + $0x858] sm:$0xf0]  ;;  %v5351_v57 = vld [vmem:[#allocation5 + $0xb2c] sm:$0xf]  ;;  %v5738_v30 = vld [vmem:[#allocation7] sm:$0xf] }
 0x16d   :  { %2961 = vmatpush.bf16.msra.mxu3 %v4173_v47  ;;  %v5331_v47 = vld [vmem:[#allocation5 + $0xa8c] sm:$0xf]  ;;  %v4445_v40 = vor.u32 %v5259_v50, %v4442_v51  ;;  %v4426_v63 = vld [vmem:[#allocation5 + $0x838] sm:$0xf0]  ;;  %v514_v33 = vperm.slane %v5738_v30, 2 }
 0x16e   :  { %2973 = vmatpush.bf16.msra.mxu0 %v4317_v43  ;;  %v4733_v43 = vor.u32 %v5331_v47, %v4730_v24  ;;  %v5255_v62 = vld [vmem:[#allocation5 + $0x82c] sm:$0xf]  ;;  %v4554_v3 = vld [vmem:[#allocation5 + $0x938] sm:$0xf0]  ;;  %v5373_v47 = vld [vmem:[%s5814_s3 + $0x38] sm:$0xff] }
 0x16f   :  { %2936 = vmatpush.bf16.msra.mxu1 %v3901_v41  ;;  %v5355_v41 = vld [vmem:[#allocation5 + $0xb4c] sm:$0xf]  ;;  %v4429_v7 = vor.u32 %v5255_v62, %v4426_v63  ;;  %v4794_v9 = vld [vmem:[#allocation5 + $0xb18] sm:$0xf0] }
 0x170   :  { %2949 = vmatpush.bf16.msra.mxu2 %v4029_v44  ;;  %v4826_v44 = vld [vmem:[#allocation5 + $0xb58] sm:$0xf0]  ;;  %v5287_v0 = vld [vmem:[#allocation5 + $0x92c] sm:$0xf] }
 0x171   :  { %2962 = vmatpush.bf16.msra.mxu3 %v4157_v45  ;;  %v5291_v45 = vld [vmem:[#allocation5 + $0x94c] sm:$0xf]  ;;  %v4557_v11 = vor.u32 %v5287_v0, %v4554_v3  ;;  %v4538_v15 = vld [vmem:[#allocation5 + $0x918] sm:$0xf0]  ;;  %v3034_v0 = vmax.f32 %v5681_v22, 0.0 }
 0x172   :  { %2974 = vmatpush.bf16.msra.mxu0 %v4301_v48  ;;  %2937 = vmatmul.bf16.vlgmr.msra.gmra.mxu1 %v5610_v58  ;;  %v5359_v58 = vld [vmem:[#allocation5 + $0xb6c] sm:$0xf]  ;;  %v4810_v48 = vld [vmem:[#allocation5 + $0xb38] sm:$0xf0] }
 0x173   :  { %2981 = vmatpush.bf16.msrb.mxu1 %v4525_v52  ;;  %2950 = vmatmul.bf16.vlgmr.msra.gmra.mxu2 %v5613_v61  ;;  %v4474_v61 = vld [vmem:[#allocation5 + $0x898] sm:$0xf0]  ;;  %v4845_v34 = vor.u32 %v5359_v58, %v4842_v38  ;;  %v4813_v6 = vor.u32 %v5351_v57, %v4810_v48  ;;  %v5283_v14 = vld [vmem:[#allocation5 + $0x90c] sm:$0xf] }
 0x174   :  { %2994 = vmatpush.bf16.msrb.mxu2 %v4653_v5  ;;  %2963 = vmatmul.bf16.vlgmr.msra.gmra.mxu3 %v5605_v37  ;;  %v4477_v37 = vor.u32 %v5267_v18, %v4474_v61  ;;  %v4570_v52 = vld [vmem:[#allocation5 + $0x958] sm:$0xf0]  ;;  %v4541_v24 = vor.u32 %v5283_v14, %v4538_v15  ;;  %v5386_v29 = vld [vmem:[%s5814_s3 + $0xa0] sm:$0xff] }
 0x175   :  { %3007 = vmatpush.bf16.msrb.mxu3 %v4781_v54  ;;  %v4698_v5 = vld [vmem:[#allocation5 + $0xa58] sm:$0xf0]  ;;  %v4829_v54 = vor.u32 %v5355_v41, %v4826_v44  ;;  %v4573_v59 = vor.u32 %v5291_v45, %v4570_v52  ;;  %v5385_v41 = vld [vmem:[%s5814_s3 + $0x98] sm:$0xff]  ;;  %v5374_v62 = vld [vmem:[%s5814_s3 + $0x40] sm:$0xff] }
 0x176   :  { %2975 = vmatpush.bf16.msra.mxu0 %v4285_v20  ;;  %v5689_v55 = vpop.f32.mrf.mxu2  ;;  %v4701_v60 = vor.u32 %v5323_v53, %v4698_v5  ;;  %v5347_v20 = vld [vmem:[#allocation5 + $0xb0c] sm:$0xf]  ;;  %v5380_v26 = vld [vmem:[%s5814_s3 + $0x70] sm:$0xff] }
 0x177   :  { %2982 = vmatpush.bf16.msrb.mxu1 %v4509_v1  ;;  %v5319_v1 = vld [vmem:[#allocation5 + $0xa2c] sm:$0xf]  ;;  %v5695_v56 = vpop.f32.mrf.mxu1  ;;  %v4797_v18 = vor.u32 %v5347_v20, %v4794_v9  ;;  %v5388_v27 = vld [vmem:[%s5814_s3 + $0xb0] sm:$0xff] }
 0x178   :  { %2995 = vmatpush.bf16.msrb.mxu2 %v4637_v2  ;;  %v4682_v2 = vld [vmem:[#allocation5 + $0xa38] sm:$0xf0] }
 0x179   :  { %3008 = vmatpush.bf16.msrb.mxu3 %v4765_v4  ;;  %2976 = vmatmul.bf16.vlgmr.msra.gmra.mxu0 %v5607_v42  ;;  %v5691_v42 = vpop.f32.mrf.mxu3  ;;  %v5693_v4 = vpop.f32.mrf.mxu0  ;;  %v4685_v12 = vor.u32 %v5319_v1, %v4682_v2  ;;  %v5376_v51 = vld [vmem:[%s5814_s3 + $0x50] sm:$0xff]  ;;  %v5382_v1 = vld [vmem:[%s5814_s3 + $0x80] sm:$0xff] }
 0x17a   :  { %3022 = vmatpush.bf16.msrb.mxu0 %v2407_v39  ;;  %v5251_v39 = vld [vmem:[#allocation5 + $0x80c] sm:$0xf]  ;;  %v5384_v53 = vld [vmem:[%s5814_s3 + $0x90] sm:$0xff] }
 0x17b   :  { %2983 = vmatpush.bf16.msrb.mxu1 %v4493_v13  ;;  %v4410_v13 = vld [vmem:[#allocation5 + $0x818] sm:$0xf0] }
 0x17c   :  { %2996 = vmatpush.bf16.msrb.mxu2 %v4621_v16  ;;  %v5315_v16 = vld [vmem:[#allocation5 + $0xa0c] sm:$0xf]  ;;  %v4413_v21 = vor.u32 %v5251_v39, %v4410_v13 }
 0x17d   :  { %3009 = vmatpush.bf16.msrb.mxu3 %v4749_v17  ;;  %v4666_v17 = vld [vmem:[#allocation5 + $0xa18] sm:$0xf0] }
 0x17e   :  { %3023 = vmatpush.bf16.msrb.mxu0 %v4861_v23  ;;  %v2732_v61 = vpop.f32.mrf.mxu2  ;;  %v4669_v23 = vor.u32 %v5315_v16, %v4666_v17 }
 0x17f   :  { %2984 = vmatpush.bf16.msrb.mxu1 %v4477_v37  ;;  %v5381_v37 = vld [vmem:[%s5814_s3 + $0x78] sm:$0xff]  ;;  %v2771_v38 = vpop.f32.mrf.mxu1 }
 0x180   :  { %2997 = vmatpush.bf16.msrb.mxu2 %v4605_v25  ;;  %v5389_v25 = vld [vmem:[%s5814_s3 + $0xb8] sm:$0xff] }
 0x181   :  { %3010 = vmatpush.bf16.msrb.mxu3 %v4733_v43  ;;  %v2745_v19 = vpop.f32.mrf.mxu3  ;;  %v2758_v58 = vpop.f32.mrf.mxu0  ;;  %v5372_v43 = vld [vmem:[%s5814_s3 + $0x30] sm:$0xff] }
 0x182   :  { %3024 = vmatpush.bf16.msrb.mxu0 %v4845_v34  ;;  %v5369_v34 = vld [vmem:[%s5814_s3 + $0x18] sm:$0xff] }
 0x183   :  { %2985 = vmatpush.bf16.msrb.mxu1 %v4461_v35  ;;  %v5377_v35 = vld [vmem:[%s5814_s3 + $0x58] sm:$0xff] }
 0x184   :  { %2998 = vmatpush.bf16.msrb.mxu2 %v4589_v46  ;;  %v2731_v46 = vadd.f32 %v5689_v55, %v514_v33  ;;  %v5375_v55 = vld [vmem:[%s5814_s3 + $0x48] sm:$0xff]  ;;  %v5397_v58 = vld [vmem:[%s5814_s3 + $0xf8] sm:$0xff] }
 0x185   :  { %3011 = vmatpush.bf16.msrb.mxu3 %v4717_v49  ;;  %v5368_v49 = vld [vmem:[%s5814_s3 + $0x10] sm:$0xff] }
 0x186   :  { %3025 = vmatpush.bf16.msrb.mxu0 %v4829_v54  ;;  %v2744_v5 = vadd.f32 %v5691_v42, %v2731_v46  ;;  %v5367_v54 = vld [vmem:[%s5814_s3 + $0x8] sm:$0xff]  ;;  %v5366_v42 = vld [vmem:[%s5814_s3] sm:$0xff] }
 0x187   :  { %2986 = vmatpush.bf16.msrb.mxu1 %v4445_v40  ;;  %v5383_v40 = vld [vmem:[%s5814_s3 + $0x88] sm:$0xff] }
 0x188   :  { %2999 = vmatpush.bf16.msrb.mxu2 %v4573_v59  ;;  %v2757_v48 = vadd.f32 %v5693_v4, %v2744_v5 }
 0x189   :  { %3012 = vmatpush.bf16.msrb.mxu3 %v4701_v60  ;;  %v3033_v60 = vmax.f32 %v5657_v8, 0.0  ;;  %v3038_v8 = vpack.c.bf16 %v3034_v0, %v3034_v0 }
 0x18a   :  { %3026 = vmatpush.bf16.msrb.mxu0 %v4813_v6  ;;  %v2770_v2 = vadd.f32 %v5695_v56, %v2757_v48 }
 0x18b   :  { %2987 = vmatpush.bf16.msrb.mxu1 %v4429_v7  ;;  %v3037_v4 = vpack.c.bf16 %v3033_v60, %v3033_v60 }
 0x18c   :  { %3000 = vmatpush.bf16.msrb.mxu2 %v4557_v11 }
 0x18d   :  { %3013 = vmatpush.bf16.msrb.mxu3 %v4685_v12 }
 0x18e   :  { %3027 = vmatpush.bf16.msrb.mxu0 %v4797_v18 }
 0x18f   :  { %2988 = vmatpush.bf16.msrb.mxu1 %v4413_v21 }
 0x190   :  { %3001 = vmatpush.bf16.msrb.mxu2 %v4541_v24 }
 0x191   :  { %3014 = vmatpush.bf16.msrb.mxu3 %v4669_v23  ;;  %4865 = vmatmul.msk.bf16.vlgmr.msrb.gmra.mxu0 %vm2390_vm1, %v5617_v10  ;;  %v5371_v10 = vld [vmem:[%s5814_s3 + $0x28] sm:$0xff] }
 0x192   :  { %3301 = vmatpush.bf16.msra.mxu0 %v5373_v47  ;;  %2989 = vmatmul.bf16.vlgmr.msrb.gmra.mxu1 %v5621_v31  ;;  %v5387_v31 = vld [vmem:[%s5814_s3 + $0xa8] sm:$0xff] }
 0x193   :  { %3314 = vmatpush.bf16.msra.mxu1 %v5381_v37  ;;  %3002 = vmatmul.bf16.vlgmr.msrb.gmra.mxu2 %v5625_v36  ;;  %v5378_v36 = vld [vmem:[%s5814_s3 + $0x60] sm:$0xff] }
 0x194   :  { %3327 = vmatpush.bf16.msra.mxu2 %v5389_v25  ;;  %3015 = vmatmul.bf16.vlgmr.msrb.gmra.mxu3 %v5623_v32  ;;  %v5370_v32 = vld [vmem:[%s5814_s3 + $0x20] sm:$0xff]  ;;  %v5396_v25 = vld [vmem:[%s5814_s3 + $0xf0] sm:$0xff] }
 0x195   :  { %3340 = vmatpush.bf16.msra.mxu3 %v5397_v58 }
 0x196   :  { %3302 = vmatpush.bf16.msra.mxu0 %v5372_v43  ;;  %v2782_v44 = vpop.f32.mrf.mxu2  ;;  %v2808_v45 = vpop.f32.mrf.mxu0 }
 0x197   :  { %3315 = vmatpush.bf16.msra.mxu1 %v5380_v26  ;;  %v2795_v50 = vpop.f32.mrf.mxu3  ;;  %v2821_v52 = vpop.f32.mrf.mxu1  ;;  %v2783_v6 = vadd.f32 %v2782_v44, %v2770_v2 }
 0x198   :  { %3328 = vmatpush.bf16.msra.mxu2 %v5388_v27  ;;  %v5395_v27 = vld [vmem:[%s5814_s3 + $0xe8] sm:$0xff] }
 0x199   :  { %v2796_v7 = vadd.f32 %v2795_v50, %v2783_v6  ;;  %3341 = vmatpush.bf16.msra.mxu3 %v5396_v25 }
 0x19a   :  { %3303 = vmatpush.bf16.msra.mxu0 %v5371_v10 }
 0x19b   :  { %3316 = vmatpush.bf16.msra.mxu1 %v5379_v28  ;;  %v2809_v20 = vadd.f32 %v2808_v45, %v2796_v7  ;;  %v5394_v28 = vld [vmem:[%s5814_s3 + $0xe0] sm:$0xff]  ;;  %v5406_v7 = vld [vmem:[#allocation8] ss:$0 sm:$0xff] }
 0x19c   :  { %3329 = vmatpush.bf16.msra.mxu2 %v5387_v31  ;;  %v5393_v31 = vld [vmem:[%s5814_s3 + $0xd8] sm:$0xff] }
 0x19d   :  { %v2822_v22 = vadd.f32 %v2821_v52, %v2809_v20  ;;  %3342 = vmatpush.bf16.msra.mxu3 %v5395_v27 }
 0x19e   :  { %3304 = vmatpush.bf16.msra.mxu0 %v5370_v32  ;;  %v2784_v57 = vpop.f32.mrf.mxu2  ;;  %v2810_v63 = vpop.f32.mrf.mxu0  ;;  %v515_v32 = vperm.slane %v5738_v30, 3  ;;  %v5390_v30 = vld [vmem:[%s5814_s3 + $0xc0] sm:$0xff] }
 0x19f   :  { %3317 = vmatpush.bf16.msra.mxu1 %v5378_v36  ;;  %v2797_v59 = vpop.f32.mrf.mxu3  ;;  %v2823_v3 = vpop.f32.mrf.mxu1 }
 0x1a0   :  { %3330 = vmatpush.bf16.msra.mxu2 %v5386_v29  ;;  %v5392_v29 = vld [vmem:[%s5814_s3 + $0xd0] sm:$0xff] }
 0x1a1   :  { %3343 = vmatpush.bf16.msra.mxu3 %v5394_v28 }
 0x1a2   :  { %3305 = vmatpush.bf16.msra.mxu0 %v5369_v34 }
 0x1a3   :  { %3318 = vmatpush.bf16.msra.mxu1 %v5377_v35  ;;  %v5391_v35 = vld [vmem:[%s5814_s3 + $0xc8] sm:$0xff]  ;;  %s5543_s3 = smov [#allocation10]  }
 0x1a4   :  { %3331 = vmatpush.bf16.msra.mxu2 %v5385_v41  ;;  %s3360_s17 = sshll.u32 %s5543_s3, 4  ;;  %s3361_s17 = int_to_ptr.vmem [resolvable:$true] %s3360_s17 }
 0x1a5   :  { %3344 = vmatpush.bf16.msra.mxu3 %v5393_v31 }
 0x1a6   :  { %3306 = vmatpush.bf16.msra.mxu0 %v5368_v49 }
 0x1a7   :  { %3319 = vmatpush.bf16.msra.mxu1 %v5376_v51 }
 0x1a8   :  { %3332 = vmatpush.bf16.msra.mxu2 %v5384_v53 }
 0x1a9   :  { %3345 = vmatpush.bf16.msra.mxu3 %v5392_v29 }
 0x1aa   :  { %3307 = vmatpush.bf16.msra.mxu0 %v5367_v54 }
 0x1ab   :  { %3320 = vmatpush.bf16.msra.mxu1 %v5375_v55 }
 0x1ac   :  { %3333 = vmatpush.bf16.msra.mxu2 %v5383_v40 }
 0x1ad   :  { %3346 = vmatpush.bf16.msra.mxu3 %v5391_v35 }
 0x1ae   :  { %3308 = vmatpush.bf16.msra.mxu0 %v5366_v42 }
 0x1af   :  { %3321 = vmatpush.bf16.msra.mxu1 %v5374_v62  ;;  %v2873_v9 = vpop.f32.mrf.mxu1 }
 0x1b0   :  { %3334 = vmatpush.bf16.msra.mxu2 %v5382_v1 }
 0x1b1   :  { %3309 = vmatmul.bf16.vlgmr.msra.gmra.mxu0 %v3037_v4  ;;  %3347 = vmatpush.bf16.msra.mxu3 %v5390_v30 }
 0x1b2   :  { %3322 = vmatmul.bf16.vlgmr.msra.gmra.mxu1 %v3038_v8 }
 0x1b6   :  { %v2834_v11 = vpop.f32.mrf.mxu2  ;;  %v2860_v13 = vpop.f32.mrf.mxu0 }
 0x1b7   :  { %v2835_v12 = vadd.f32 %v2834_v11, %v2822_v22  ;;  %v2847_v39 = vpop.f32.mrf.mxu3  ;;  %v2875_v15 = vpop.f32.mrf.mxu1 }
 0x1b9   :  { %v2848_v14 = vadd.f32 %v2847_v39, %v2835_v12 }
 0x1bb   :  { %v2861_v16 = vadd.f32 %v2860_v13, %v2848_v14 }
 0x1bd   :  { %v2874_v56 = vadd.f32 %v2873_v9, %v2861_v16 }
 0x1be   :  { %v2836_v17 = vpop.f32.mrf.mxu2  ;;  %v2862_v19 = vpop.f32.mrf.mxu0 }
 0x1bf   :  { %v3035_v18 = vmax.f32 %v2874_v56, 0.0  ;;  %v2849_v61 = vpop.f32.mrf.mxu3 }
 0x1c1   :  { %v3039_v21 = vpack.c.bf16 %v3035_v18, %v3035_v18 }
 0x1c3   :  { %3335 = vmatmul.bf16.vlgmr.msra.gmra.mxu2 %v3039_v21 }
 0x1cf   :  { %v2886_v47 = vpop.f32.mrf.mxu1 }
 0x1d0   :  { %v2887_v33 = vadd.f32 %v2886_v47, %v515_v32 }
 0x1d6   :  { %v2899_v24 = vpop.f32.mrf.mxu2  ;;  %v2925_v37 = vpop.f32.mrf.mxu0 }
 0x1d7   :  { %v2912_v23 = vpop.f32.mrf.mxu3  ;;  %v2888_v38 = vpop.f32.mrf.mxu1  ;;  %v2900_v46 = vadd.f32 %v2899_v24, %v2887_v33 }
 0x1d9   :  { %v2913_v50 = vadd.f32 %v2912_v23, %v2900_v46 }
 0x1db   :  { %v2926_v53 = vadd.f32 %v2925_v37, %v2913_v50 }
 0x1de   :  { %v2901_v43 = vpop.f32.mrf.mxu2  ;;  %v2927_v10 = vpop.f32.mrf.mxu0 }
 0x1df   :  { %v2914_v26 = vpop.f32.mrf.mxu3 }
 0x1ef   :  { %v2938_v36 = vpop.f32.mrf.mxu1 }
 0x1f0   :  { %v2939_v5 = vadd.f32 %v2938_v36, %v2926_v53 }
 0x1f6   :  { %v2951_v34 = vpop.f32.mrf.mxu2  ;;  %v2977_v44 = vpop.f32.mrf.mxu0 }
 0x1f7   :  { %v2964_v41 = vpop.f32.mrf.mxu3  ;;  %v2940_v49 = vpop.f32.mrf.mxu1  ;;  %v2952_v54 = vadd.f32 %v2951_v34, %v2939_v5 }
 0x1f9   :  { %v2965_v40 = vadd.f32 %v2964_v41, %v2952_v54 }
 0x1fb   :  { %v2978_v48 = vadd.f32 %v2977_v44, %v2965_v40 }
 0x1fe   :  { %v2953_v51 = vpop.f32.mrf.mxu2  ;;  %v2979_v52 = vpop.f32.mrf.mxu0 }
 0x1ff   :  { %v2966_v45 = vpop.f32.mrf.mxu3 }
 0x20e   :  { %v3029_v55 = vpop.f32.mrf.mxu0 }
 0x20f   :  { %v2990_v57 = vpop.f32.mrf.mxu1 }
 0x210   :  { %v2991_v42 = vadd.f32 %v2990_v57, %v2978_v48 }
 0x216   :  { %v3003_v59 = vpop.f32.mrf.mxu2  ;;  %v3031_v0 = vpop.f32.mrf.mxu0 }
 0x217   :  { %v3016_v60 = vpop.f32.mrf.mxu3  ;;  %v3004_v62 = vadd.f32 %v3003_v59, %v2991_v42  ;;  %v2992_v63 = vpop.f32.mrf.mxu1 }
 0x219   :  { %v3017_v3 = vadd.f32 %v3016_v60, %v3004_v62 }
 0x21b   :  { %v3030_v1 = vadd.f32 %v3029_v55, %v3017_v3 }
 0x21d   :  { %v3036_v2 = vmax.f32 %v3030_v1, 0.0 }
 0x21e   :  { %v3005_v4 = vpop.f32.mrf.mxu2 }
 0x21f   :  { %v3018_v8 = vpop.f32.mrf.mxu3  ;;  %v3040_v6 = vpack.c.bf16 %v3036_v2, %v3036_v2 }
 0x221   :  { %3348 = vmatmul.bf16.vlgmr.msra.gmra.mxu3 %v3040_v6 }
 0x22e   :  { %v3310_v20 = vpop.f32.mrf.mxu0 }
 0x22f   :  { %v3311_v9 = vadd.f32 %v5406_v7, %v3310_v20  ;;  %v3323_v22 = vpop.f32.mrf.mxu1 }
 0x231   :  { %v3324_v11 = vadd.f32 %v3323_v22, %v3311_v9 }
 0x236   :  { %v3312_v12 = vpop.f32.mrf.mxu0 }
 0x237   :  { %v3325_v39 = vpop.f32.mrf.mxu1 }
 0x246   :  { %v3336_v13 = vpop.f32.mrf.mxu2 }
 0x247   :  { %v3337_v14 = vadd.f32 %v3336_v13, %v3324_v11 }
 0x24e   :  { %v3338_v15 = vpop.f32.mrf.mxu2 }
 0x2a4   :  { %v3349_v16 = vpop.f32.mrf.mxu3 }
 0x2a5   :  { %v3350_v56 = vadd.f32 %v3349_v16, %v3337_v14 }
 0x2a7   :  { %3354 = vst.msk [vmem:[#allocation10] sm:$0xf] %vm3353_vm2, %v3350_v56 }
 0x2a8   :  { %3365 = dma.vmem_to_hbm [thread:$0]  %s3361_s17, 64, %s3363_s20, [#allocation4]  }
 0x2ac   :  { %v3351_v17 = vpop.f32.mrf.mxu3 }
 0x2ad   :  { %5534 = dma.done.wait [#allocation4], 64  }
 0x2ae   :  { %5535 = vsyncadd [#allocation4], 4294967232 }
 0x2af   :  { %3370 = vsyncpa [#allocation3], 1 }
 0x2b0   :  { %3371 = vsyncpa [#allocation6], 1 }
 0x2b1   :  { %3372 = vsyncpa [#allocation9], 1 }
 0x2b2   :  { %3373 = vsyncpa [#allocation4], 1 }

</bundles_post_ra>
